<compile_context>
chip_gen: v7x
topology: tpu7x:2x2x1
jax: 0.10.0
libtpu: 0.0.40
codegen_flags: <defaults>
</compile_context>

<pallas_src>
import jax
import jax.numpy as jnp
from jax.experimental import pallas as pl
from jax.experimental.pallas import tpu as pltpu


def _cooc_kernel(qkeys_ref, okeys_ref, params_ref, w2t_ref,
                 src_out_ref, dst_out_ref):
    # Per grid step (one tile of TB batch rows), with R = TB*(Ls+Ld):
    #   qkeys_ref  : (R, 1)    int32 composite keys (id*TB + b), position-major
    #                          (row r = pos*TB + b); src positions first, then dst.
    #   okeys_ref  : (1, 1, R) int32 same keys in the same order, lane-major view.
    #   params_ref : (8, F)    f32; row 0 = w1, row 1 = b1, row 2 = 2*b2.
    #   w2t_ref    : (F, F)    f32 second Linear weight, pre-transposed (W2.T).
    #   src_out_ref: (TB, Ls*F) f32 lane-dense output slab.
    #   dst_out_ref: (TB, Ld*F) f32 lane-dense output slab.
    tb = src_out_ref.shape[0]
    feat = w2t_ref.shape[0]
    ls = src_out_ref.shape[1] // feat
    ld = dst_out_ref.shape[1] // feat
    n_src = tb * ls

    q = qkeys_ref[...]                        # (R, 1) query keys on sublanes
    o = okeys_ref[...][:, 0, :]               # (1, R) "other" keys on lanes
    o_src = o[:, :n_src]                      # (1, TB*Ls)
    o_dst = o[:, n_src:]                      # (1, TB*Ld)

    # ---- co-occurrence counting: one compare per pair (key encodes id AND batch)
    eq_src = (q == o_src).astype(jnp.float32)            # (R, TB*Ls)
    eq_dst = (q == o_dst).astype(jnp.float32)            # (R, TB*Ld)
    c_src = jnp.sum(eq_src, axis=1, keepdims=True)       # (R, 1) exact counts
    c_dst = jnp.sum(eq_dst, axis=1, keepdims=True)       # (R, 1)
    # TODO(synk): for realistic neighbor-list lengths, strip-mine the "other"
    # axis into 128-256 lane chunks (accumulate c_*) and/or move the reduction
    # onto the MXU as eq @ ones to keep VMEM/vregs bounded (v7x: 64 MiB VMEM).

    # padded positions (id == 0  <=>  key = b < TB) get zeroed counts
    valid = q >= tb
    c_src = jnp.where(valid, c_src, 0.0)
    c_dst = jnp.where(valid, c_dst, 0.0)

    # ---- MLP: Linear(1->F) + ReLU per channel, channel sum, Linear(F->F) ----
    # Implicit (R,1) x (1,F) broadcasting; no materialized (R,F) w1/b1 temporaries.
    params = params_ref[...]
    w1 = params[0:1, :]                                   # (1, F)
    b1 = params[1:2, :]                                   # (1, F)
    b2x2 = params[2:3, :]                                 # (1, F) == 2 * b2

    h = (jnp.maximum(c_src * w1 + b1, 0.0)
         + jnp.maximum(c_dst * w1 + b1, 0.0))             # (R, F)

    # single fused MXU matmul over all src+dst rows of the batch tile
    res = jnp.dot(h, w2t_ref[...], preferred_element_type=jnp.float32) + b2x2

    # ---- lane-dense epilogue: assemble slabs in registers, one store each ----
    src_slab = jnp.concatenate(
        [res[i * tb:(i + 1) * tb, :] for i in range(ls)], axis=1)         # (TB, Ls*F)
    dst_slab = jnp.concatenate(
        [res[n_src + j * tb:n_src + (j + 1) * tb, :] for j in range(ld)],
        axis=1)                                                            # (TB, Ld*F)
    src_out_ref[...] = src_slab
    dst_out_ref[...] = dst_slab


def neighbor_cooccurrence_encoder(src_ids, dst_ids, W1, b1, W2, b2, *, tile_batch=8):
    """src_ids: (B, Ls) int32, dst_ids: (B, Ld) int32 (0 = padding id).
    W1: (F, 1), b1: (F,), W2: (F, F), b2: (F,)  (nn.Linear layouts).
    Returns (src_feats (B, Ls, F), dst_feats (B, Ld, F)).

    tile_batch: batch rows per grid step.  Default 8 keeps grid >= 4 so both
    v7x TensorCores get work; on single-TC v5e / v6e raise to 16-32 to
    amortize the ~0.35us per-step pipeline overhead."""
    B, Ls = src_ids.shape
    Bd, Ld = dst_ids.shape
    assert B == Bd and B % tile_batch == 0, "batch must be divisible by tile_batch"
    F = W2.shape[0]
    TB = tile_batch
    G = B // TB
    R = TB * (Ls + Ld)          # query rows per tile (== "other" columns per tile)

    src3 = src_ids.astype(jnp.int32).reshape(G, TB, Ls)
    dst3 = dst_ids.astype(jnp.int32).reshape(G, TB, Ld)

    # Composite keys: key = id*TB + batch_row_in_tile.  Padding (id==0) -> key < TB.
    # NOTE: requires max(id)*TB + TB-1 to fit in int32.
    bvec = jnp.arange(TB, dtype=jnp.int32)[None, :, None]      # (1, TB, 1)
    src_k = src3 * TB + bvec                                    # (G, TB, Ls)
    dst_k = dst3 * TB + bvec                                    # (G, TB, Ld)

    # One key array per tile, position-major (row r = pos*TB + b), src then dst.
    # Its sublane (query) and lane ("other") kernel views are free reshapes.
    keys = jnp.concatenate(
        [jnp.transpose(src_k, (0, 2, 1)).reshape(G, Ls * TB),
         jnp.transpose(dst_k, (0, 2, 1)).reshape(G, Ld * TB)], axis=1)   # (G, R)
    keys_col = keys.reshape(G * R, 1)       # query view, (R,1) block per step
    keys_row = keys.reshape(G, 1, R)        # lane view,  (1,1,R) block per step

    # Packed MLP parameters: one (8, F) tile (row0 w1, row1 b1, row2 2*b2).
    params = jnp.zeros((8, F), jnp.float32)
    params = params.at[0].set(W1.reshape(F).astype(jnp.float32))
    params = params.at[1].set(b1.reshape(F).astype(jnp.float32))
    params = params.at[2].set(2.0 * b2.reshape(F).astype(jnp.float32))
    w2t = W2.T.astype(jnp.float32)

    src_flat, dst_flat = pl.pallas_call(
        _cooc_kernel,
        out_shape=(jax.ShapeDtypeStruct((B, Ls * F), jnp.float32),
                   jax.ShapeDtypeStruct((B, Ld * F), jnp.float32)),
        grid=(G,),
        in_specs=[
            pl.BlockSpec((R, 1), lambda g: (g, 0)),        # query keys (sublanes)
            pl.BlockSpec((1, 1, R), lambda g: (g, 0, 0)),  # "other" keys (lanes)
            pl.BlockSpec((8, F), lambda g: (0, 0)),        # packed w1/b1/2*b2
            pl.BlockSpec((F, F), lambda g: (0, 0)),        # W2^T
        ],
        out_specs=(
            pl.BlockSpec((TB, Ls * F), lambda g: (g, 0)),  # lane-dense src slab
            pl.BlockSpec((TB, Ld * F), lambda g: (g, 0)),  # lane-dense dst slab
        ),
        compiler_params=pltpu.CompilerParams(
            dimension_semantics=("parallel",)),
    )(keys_col, keys_row, params, w2t)

    # free contiguous reshape back to (B, L, F) outside the kernel
    return src_flat.reshape(B, Ls, F), dst_flat.reshape(B, Ld, F)


def _reference(src_ids, dst_ids, W1, b1, W2, b2):
    """Pure-JAX reproduction of the PyTorch forward for validation."""
    def counts(a, b):
        return (a[:, :, None] == b[:, None, :]).sum(-1).astype(jnp.float32)

    src_app = jnp.stack([counts(src_ids, src_ids), counts(src_ids, dst_ids)], axis=-1)
    dst_app = jnp.stack([counts(dst_ids, src_ids), counts(dst_ids, dst_ids)], axis=-1)
    src_app = jnp.where((src_ids == 0)[..., None], 0.0, src_app)
    dst_app = jnp.where((dst_ids == 0)[..., None], 0.0, dst_app)

    def mlp(app):
        x = app[..., None]                                   # (B, L, 2, 1)
        h = jax.nn.relu(x @ W1.T + b1)                       # Linear(1, F) + ReLU
        y = h @ W2.T + b2                                    # Linear(F, F)
        return y.sum(axis=2)                                 # sum over the 2 channels

    return mlp(src_app), mlp(dst_app)


if __name__ == "__main__":
    B, Ls, Ld, F = 32, 8, 16, 32      # grid = B/8 = 4 steps (keeps both v7x TCs busy)

    key = jax.random.PRNGKey(0)
    k_src, k_dst, k_w1, k_b1, k_w2, k_b2 = jax.random.split(key, 6)

    # padded neighbor-id sequences (0 = padding), small id range to force repeats
    src_ids = jax.random.randint(k_src, (B, Ls), 0, 7, dtype=jnp.int32)
    dst_ids = jax.random.randint(k_dst, (B, Ld), 0, 7, dtype=jnp.int32)

    # deterministic parameter init matching nn.Linear shapes:
    # Linear(1, F): weight (F, 1), bias (F,);  Linear(F, F): weight (F, F), bias (F,)
    W1 = jax.random.uniform(k_w1, (F, 1), jnp.float32, -1.0, 1.0)
    b1 = jax.random.uniform(k_b1, (F,), jnp.float32, -1.0, 1.0)
    W2 = jax.random.uniform(k_w2, (F, F), jnp.float32, -1.0, 1.0) / jnp.sqrt(F)
    b2 = jax.random.uniform(k_b2, (F,), jnp.float32, -1.0, 1.0)

    src_feat, dst_feat = neighbor_cooccurrence_encoder(
        src_ids, dst_ids, W1, b1, W2, b2, tile_batch=8)
    jax.block_until_ready((src_feat, dst_feat))

    ref_src, ref_dst = _reference(src_ids, dst_ids, W1, b1, W2, b2)
    assert src_feat.shape == (B, Ls, F) and dst_feat.shape == (B, Ld, F)
    assert jnp.allclose(src_feat, ref_src, atol=1e-4, rtol=1e-4)
    assert jnp.allclose(dst_feat, ref_dst, atol=1e-4, rtol=1e-4)

    print("KERNEL_OK")
</pallas_src>

<mosaic_0001>
module attributes {stable_mosaic.version = 11 : i64} {
  func.func @_cooc_kernel(%arg0: i32, %arg1: memref<192x1xi32, #tpu.memory_space<vmem>>, %arg2: memref<1x1x192xi32, #tpu.memory_space<vmem>>, %arg3: memref<8x32xf32, #tpu.memory_space<vmem>>, %arg4: memref<32x32xf32, #tpu.memory_space<vmem>>, %arg5: memref<8x256xf32, #tpu.memory_space<vmem>>, %arg6: memref<8x512xf32, #tpu.memory_space<vmem>>) attributes {dimension_semantics = [#tpu.dimension_semantics<parallel>], iteration_bounds = array<i64: 4>, scalar_prefetch = 0 : i64, scratch_operands = 0 : i64, tpu.core_type = #tpu.core_type<tc>, window_params = [{transform_indices = @transform_0, window_bounds = array<i64: 192, 1>}, {transform_indices = @transform_1, window_bounds = array<i64: 1, 1, 192>}, {pipeline_mode = #tpu.pipeline_mode<synchronous>, transform_indices = @transform_2, window_bounds = array<i64: 8, 32>}, {pipeline_mode = #tpu.pipeline_mode<synchronous>, transform_indices = @transform_3, window_bounds = array<i64: 32, 32>}, {transform_indices = @transform_4, window_bounds = array<i64: 8, 256>}, {transform_indices = @transform_5, window_bounds = array<i64: 8, 512>}]} {
    %c0 = arith.constant 0 : index
    %c0_0 = arith.constant 0 : index
    %0 = vector.load %arg1[%c0, %c0_0] : memref<192x1xi32, #tpu.memory_space<vmem>>, vector<192x1xi32>
    %c0_1 = arith.constant 0 : index
    %c0_2 = arith.constant 0 : index
    %c0_3 = arith.constant 0 : index
    %1 = vector.load %arg2[%c0_1, %c0_2, %c0_3] : memref<1x1x192xi32, #tpu.memory_space<vmem>>, vector<1x1x192xi32>
    %2 = vector.shape_cast %1 : vector<1x1x192xi32> to vector<1x192xi32>
    %3 = vector.extract_strided_slice %2 {offsets = [0, 0], sizes = [1, 64], strides = [1, 1]} : vector<1x192xi32> to vector<1x64xi32>
    %4 = vector.extract_strided_slice %2 {offsets = [0, 64], sizes = [1, 128], strides = [1, 1]} : vector<1x192xi32> to vector<1x128xi32>
    %5 = vector.broadcast %0 : vector<192x1xi32> to vector<192x64xi32>
    %6 = vector.broadcast %3 : vector<1x64xi32> to vector<192x64xi32>
    %7 = arith.cmpi eq, %5, %6 : vector<192x64xi32>
    %8 = arith.extui %7 : vector<192x64xi1> to vector<192x64xi32>
    %9 = arith.sitofp %8 : vector<192x64xi32> to vector<192x64xf32>
    %10 = vector.broadcast %0 : vector<192x1xi32> to vector<192x128xi32>
    %11 = vector.broadcast %4 : vector<1x128xi32> to vector<192x128xi32>
    %12 = arith.cmpi eq, %10, %11 : vector<192x128xi32>
    %13 = arith.extui %12 : vector<192x128xi1> to vector<192x128xi32>
    %14 = arith.sitofp %13 : vector<192x128xi32> to vector<192x128xf32>
    %cst = arith.constant dense<0.000000e+00> : vector<192xf32>
    %15 = vector.multi_reduction <add>, %9, %cst [1] : vector<192x64xf32> to vector<192xf32>
    %16 = vector.shape_cast %15 : vector<192xf32> to vector<192x1xf32>
    %cst_4 = arith.constant dense<0.000000e+00> : vector<192xf32>
    %17 = vector.multi_reduction <add>, %14, %cst_4 [1] : vector<192x128xf32> to vector<192xf32>
    %18 = vector.shape_cast %17 : vector<192xf32> to vector<192x1xf32>
    %c8_i32 = arith.constant 8 : i32
    %19 = vector.broadcast %c8_i32 : i32 to vector<192x1xi32>
    %20 = arith.cmpi sge, %0, %19 : vector<192x1xi32>
    %cst_5 = arith.constant 0.000000e+00 : f32
    %21 = vector.broadcast %cst_5 : f32 to vector<192x1xf32>
    %22 = arith.select %20, %16, %21 : vector<192x1xi1>, vector<192x1xf32>
    %cst_6 = arith.constant 0.000000e+00 : f32
    %23 = vector.broadcast %cst_6 : f32 to vector<192x1xf32>
    %24 = arith.select %20, %18, %23 : vector<192x1xi1>, vector<192x1xf32>
    %c0_7 = arith.constant 0 : index
    %c0_8 = arith.constant 0 : index
    %25 = vector.load %arg3[%c0_7, %c0_8] : memref<8x32xf32, #tpu.memory_space<vmem>>, vector<8x32xf32>
    %26 = vector.extract_strided_slice %25 {offsets = [0, 0], sizes = [1, 32], strides = [1, 1]} : vector<8x32xf32> to vector<1x32xf32>
    %27 = vector.extract_strided_slice %25 {offsets = [1, 0], sizes = [1, 32], strides = [1, 1]} : vector<8x32xf32> to vector<1x32xf32>
    %28 = vector.extract_strided_slice %25 {offsets = [2, 0], sizes = [1, 32], strides = [1, 1]} : vector<8x32xf32> to vector<1x32xf32>
    %29 = vector.broadcast %22 : vector<192x1xf32> to vector<192x32xf32>
    %30 = vector.broadcast %26 : vector<1x32xf32> to vector<192x32xf32>
    %31 = arith.mulf %29, %30 : vector<192x32xf32>
    %32 = vector.broadcast %27 : vector<1x32xf32> to vector<192x32xf32>
    %33 = arith.addf %31, %32 : vector<192x32xf32>
    %cst_9 = arith.constant 0.000000e+00 : f32
    %34 = vector.broadcast %cst_9 : f32 to vector<192x32xf32>
    %35 = arith.maximumf %33, %34 : vector<192x32xf32>
    %36 = vector.broadcast %24 : vector<192x1xf32> to vector<192x32xf32>
    %37 = vector.broadcast %26 : vector<1x32xf32> to vector<192x32xf32>
    %38 = arith.mulf %36, %37 : vector<192x32xf32>
    %39 = vector.broadcast %27 : vector<1x32xf32> to vector<192x32xf32>
    %40 = arith.addf %38, %39 : vector<192x32xf32>
    %cst_10 = arith.constant 0.000000e+00 : f32
    %41 = vector.broadcast %cst_10 : f32 to vector<192x32xf32>
    %42 = arith.maximumf %40, %41 : vector<192x32xf32>
    %43 = arith.addf %35, %42 : vector<192x32xf32>
    %c0_11 = arith.constant 0 : index
    %c0_12 = arith.constant 0 : index
    %44 = vector.load %arg4[%c0_11, %c0_12] : memref<32x32xf32, #tpu.memory_space<vmem>>, vector<32x32xf32>
    %cst_13 = arith.constant dense<0.000000e+00> : vector<192x32xf32>
    %45 = tpu.matmul %43, %44, %cst_13 {dimension_numbers = #tpu.dot_dimension_numbers<[1], [0], [0], [1], [0, 0, 1, 1], [], []>} : vector<192x32xf32>, vector<32x32xf32>, vector<192x32xf32> -> vector<192x32xf32>
    %46 = vector.broadcast %28 : vector<1x32xf32> to vector<192x32xf32>
    %47 = arith.addf %45, %46 : vector<192x32xf32>
    %48 = vector.extract_strided_slice %47 {offsets = [0, 0], sizes = [8, 32], strides = [1, 1]} : vector<192x32xf32> to vector<8x32xf32>
    %49 = vector.extract_strided_slice %47 {offsets = [8, 0], sizes = [8, 32], strides = [1, 1]} : vector<192x32xf32> to vector<8x32xf32>
    %50 = vector.extract_strided_slice %47 {offsets = [16, 0], sizes = [8, 32], strides = [1, 1]} : vector<192x32xf32> to vector<8x32xf32>
    %51 = vector.extract_strided_slice %47 {offsets = [24, 0], sizes = [8, 32], strides = [1, 1]} : vector<192x32xf32> to vector<8x32xf32>
    %52 = vector.extract_strided_slice %47 {offsets = [32, 0], sizes = [8, 32], strides = [1, 1]} : vector<192x32xf32> to vector<8x32xf32>
    %53 = vector.extract_strided_slice %47 {offsets = [40, 0], sizes = [8, 32], strides = [1, 1]} : vector<192x32xf32> to vector<8x32xf32>
    %54 = vector.extract_strided_slice %47 {offsets = [48, 0], sizes = [8, 32], strides = [1, 1]} : vector<192x32xf32> to vector<8x32xf32>
    %55 = vector.extract_strided_slice %47 {offsets = [56, 0], sizes = [8, 32], strides = [1, 1]} : vector<192x32xf32> to vector<8x32xf32>
    %56 = tpu.concatenate %48, %49, %50, %51, %52, %53, %54, %55 in 1 : vector<8x32xf32>, vector<8x32xf32>, vector<8x32xf32>, vector<8x32xf32>, vector<8x32xf32>, vector<8x32xf32>, vector<8x32xf32>, vector<8x32xf32> -> vector<8x256xf32>
    %57 = vector.extract_strided_slice %47 {offsets = [64, 0], sizes = [8, 32], strides = [1, 1]} : vector<192x32xf32> to vector<8x32xf32>
    %58 = vector.extract_strided_slice %47 {offsets = [72, 0], sizes = [8, 32], strides = [1, 1]} : vector<192x32xf32> to vector<8x32xf32>
    %59 = vector.extract_strided_slice %47 {offsets = [80, 0], sizes = [8, 32], strides = [1, 1]} : vector<192x32xf32> to vector<8x32xf32>
    %60 = vector.extract_strided_slice %47 {offsets = [88, 0], sizes = [8, 32], strides = [1, 1]} : vector<192x32xf32> to vector<8x32xf32>
    %61 = vector.extract_strided_slice %47 {offsets = [96, 0], sizes = [8, 32], strides = [1, 1]} : vector<192x32xf32> to vector<8x32xf32>
    %62 = vector.extract_strided_slice %47 {offsets = [104, 0], sizes = [8, 32], strides = [1, 1]} : vector<192x32xf32> to vector<8x32xf32>
    %63 = vector.extract_strided_slice %47 {offsets = [112, 0], sizes = [8, 32], strides = [1, 1]} : vector<192x32xf32> to vector<8x32xf32>
    %64 = vector.extract_strided_slice %47 {offsets = [120, 0], sizes = [8, 32], strides = [1, 1]} : vector<192x32xf32> to vector<8x32xf32>
    %65 = vector.extract_strided_slice %47 {offsets = [128, 0], sizes = [8, 32], strides = [1, 1]} : vector<192x32xf32> to vector<8x32xf32>
    %66 = vector.extract_strided_slice %47 {offsets = [136, 0], sizes = [8, 32], strides = [1, 1]} : vector<192x32xf32> to vector<8x32xf32>
    %67 = vector.extract_strided_slice %47 {offsets = [144, 0], sizes = [8, 32], strides = [1, 1]} : vector<192x32xf32> to vector<8x32xf32>
    %68 = vector.extract_strided_slice %47 {offsets = [152, 0], sizes = [8, 32], strides = [1, 1]} : vector<192x32xf32> to vector<8x32xf32>
    %69 = vector.extract_strided_slice %47 {offsets = [160, 0], sizes = [8, 32], strides = [1, 1]} : vector<192x32xf32> to vector<8x32xf32>
    %70 = vector.extract_strided_slice %47 {offsets = [168, 0], sizes = [8, 32], strides = [1, 1]} : vector<192x32xf32> to vector<8x32xf32>
    %71 = vector.extract_strided_slice %47 {offsets = [176, 0], sizes = [8, 32], strides = [1, 1]} : vector<192x32xf32> to vector<8x32xf32>
    %72 = vector.extract_strided_slice %47 {offsets = [184, 0], sizes = [8, 32], strides = [1, 1]} : vector<192x32xf32> to vector<8x32xf32>
    %73 = tpu.concatenate %57, %58, %59, %60, %61, %62, %63, %64, %65, %66, %67, %68, %69, %70, %71, %72 in 1 : vector<8x32xf32>, vector<8x32xf32>, vector<8x32xf32>, vector<8x32xf32>, vector<8x32xf32>, vector<8x32xf32>, vector<8x32xf32>, vector<8x32xf32>, vector<8x32xf32>, vector<8x32xf32>, vector<8x32xf32>, vector<8x32xf32>, vector<8x32xf32>, vector<8x32xf32>, vector<8x32xf32>, vector<8x32xf32> -> vector<8x512xf32>
    %c0_14 = arith.constant 0 : index
    %c0_15 = arith.constant 0 : index
    %74 = vector.load %arg5[%c0_14, %c0_15] : memref<8x256xf32, #tpu.memory_space<vmem>>, vector<8x256xf32>
    tpu.vector_store %arg5[%c0_14, %c0_15], %56 {strides = array<i32>} : memref<8x256xf32, #tpu.memory_space<vmem>>, vector<8x256xf32>,
    %c0_16 = arith.constant 0 : index
    %c0_17 = arith.constant 0 : index
    %75 = vector.load %arg6[%c0_16, %c0_17] : memref<8x512xf32, #tpu.memory_space<vmem>>, vector<8x512xf32>
    tpu.vector_store %arg6[%c0_16, %c0_17], %73 {strides = array<i32>} : memref<8x512xf32, #tpu.memory_space<vmem>>, vector<8x512xf32>,
    return
  }
  func.func @transform_0(%arg0: i32) -> (i32, i32) {
    %c0_i32 = arith.constant 0 : i32
    %c0_i32_0 = arith.constant 0 : i32
    return %arg0, %c0_i32 : i32, i32
  }
  func.func @transform_1(%arg0: i32) -> (i32, i32, i32) {
    %c0_i32 = arith.constant 0 : i32
    %c0_i32_0 = arith.constant 0 : i32
    %c0_i32_1 = arith.constant 0 : i32
    return %arg0, %c0_i32, %c0_i32_0 : i32, i32, i32
  }
  func.func @transform_2(%arg0: i32) -> (i32, i32) {
    %c0_i32 = arith.constant 0 : i32
    %c0_i32_0 = arith.constant 0 : i32
    %c0_i32_1 = arith.constant 0 : i32
    return %c0_i32, %c0_i32_0 : i32, i32
  }
  func.func @transform_3(%arg0: i32) -> (i32, i32) {
    %c0_i32 = arith.constant 0 : i32
    %c0_i32_0 = arith.constant 0 : i32
    %c0_i32_1 = arith.constant 0 : i32
    return %c0_i32, %c0_i32_0 : i32, i32
  }
  func.func @transform_4(%arg0: i32) -> (i32, i32) {
    %c0_i32 = arith.constant 0 : i32
    %c0_i32_0 = arith.constant 0 : i32
    return %arg0, %c0_i32 : i32, i32
  }
  func.func @transform_5(%arg0: i32) -> (i32, i32) {
    %c0_i32 = arith.constant 0 : i32
    %c0_i32_0 = arith.constant 0 : i32
    return %arg0, %c0_i32 : i32, i32
  }
}

</mosaic_0001>

<bundles_post_ra>
// kernel: tpu_custom_call.1
= control target key start
LH: loop header
LB: loop body
LE: loop exit
PB: predicated region body
PF: predicated region fallthrough
CT: control target
= control target key end

     0   :  { %11 = vsyncpa [#allocation3], 0  ;;  %s3215_s0 = inlined_call_operand.vmem [shape: s32[768,1], index: 0, kind: input, shape index: {}]   ;;  %s3216_s1 = inlined_call_operand.vmem [shape: s32[4,1,192], index: 1, kind: input, shape index: {}]   ;;  %s3217_s2 = inlined_call_operand.vmem [shape: f32[8,32], index: 2, kind: input, shape index: {}]   ;;  %s3218_s3 = inlined_call_operand.vmem [shape: f32[32,32], index: 3, kind: input, shape index: {}]   ;;  %s3219_s4 = inlined_call_operand.hbm [shape: f32[32,256], index: 4, kind: output, shape index: {0}]   ;;  %s3220_s5 = inlined_call_operand.hbm [shape: f32[32,512], index: 5, kind: output, shape index: {1}]  }
   0x1   :  { %13 = vsyncpa [#allocation3 + $0x1], 0 }
   0x2   :  { %14 = vsyncpa [#allocation5], 0 }
   0x3   :  { %16 = vsyncpa [#allocation5 + $0x1], 0  ;;  %s2282_s18 = smov 0   ;;  %s2284_s19 = smov 0  }
   0x4   :  { %s2286_s20 = smov 0   ;;  %s2288_s21 = smov 0  }
   0x5 LB: > { %s2303_s22 = sadd.s32 4294967295, %s2243_s21   ;;  %s1804_s23 = sadd.s32 4294967294, %s2243_s21   ;;  %s2243_s21 = sphi %s2288_s21, %s3249_s21   ;;  %s2239_s20 = sphi %s2286_s20, %s3248_s20   ;;  %s2235_s19 = sphi %s2284_s19, %s3247_s19   ;;  %s2231_s18 = sphi %s2282_s18, %s3246_s18  }
   0x6   : > { %s2307_s24 = sadd.s32 1, %s2243_s21   ;;  %s123_s25 = sadd.s32 1, %s2239_s20 }
   0x7   : > { %s120_s26 = ssub.s32 %s2243_s21, %s2307_s24  ;;  %p133_p0 = scmp.ne.s32.totalorder %s2239_s20, %s2235_s19 }
   0x8   : > { %p121_p1 = scmp.eq.s32.totalorder %s120_s26, 0  ;;  %p134_p2 = scmp.eq.s32.totalorder %s2303_s22, 3 }
   0x9   : > { %p139_p3 = scmp.ne.s32.totalorder %s2235_s19, %s2231_s18  ;;  %p140_p4 = scmp.eq.s32.totalorder %s1804_s23, 3 }
   0xa   : > { %s2318_s27 = scalar_select %p121_p1, %s2239_s20, %s123_s25  }
   0xb   : > { %p2320_p5 = por %p134_p2, %p133_p0  ;;  %p2324_p6 = por %p140_p4, %p139_p3 }
   0xc   : > { %p1807_p7 = scmp.ge.s32.totalorder %s2243_s21, 1  ;;  %p206_p8 = scmp.lt.s32.totalorder %s2243_s21, 5 }
   0xe   : > { %p207_p9 = pnand %p1807_p7, %p206_p8 }
   0xf   : > { %s243_s30 = smul.u32 (!%p207_p9), 24, %s2303_s22  ;;  %v2245_v0 = vmov (!%p207_p9), 0   ;;  %p249_p11 = scmp.lt.s32.totalorder (!%p207_p9), %s2303_s22, 3  ;;  %v350_v25 = vlaneseq (!%p207_p9)  ;;  %v2246_v34 = vmov (!%p207_p9), 0.0  }
  0x10   : > { %210 = sbr.rel (%p207_p9) target bundleno = 971 (0x3cb), region = 36  ;;  %2028 = vset.pattern.permute.xlu1 (!%p207_p9), %v2245_v0  ;;  %2027 = vset.pattern.permute.xlu0 (!%p207_p9), %v2245_v0  ;;  %s2247_s15 = smov (!%p207_p9), 64  }
  0x11   : > { %p244_p10 = scmp.lt.s32.totalorder (!%p207_p9), %s243_s30, 95  ;;  %v2434_v26 = vshrl.u32 (!%p207_p9), %v350_v25, 7  ;;  %s3103_s12 = sand.u32 (!%p207_p9), 1, %s2235_s19  }
  0x12   : > { %s1809_s13 = sshll.u32 (!%p207_p9), %s3103_s12, 5  ;;  %s1892_s17 = sshll.u32 (!%p207_p9), %s2303_s22, 8 }
  0x13   : > { %v352_v27 = vsub.s32 (!%p207_p9), 0, %v2434_v26  ;;  %v428_v28 = vsub.s32 (!%p207_p9), 1, %v2434_v26  ;;  %s2250_s8 = smov (!%p207_p9), [#allocation2]  }
  0x17   : > { %s3251_s30 = smov (!%p244_p10, %s243_s30), 95 }
  0x18   : > { %s1810_s6 = sshll.u32 %s3251_s30, 3  ;;  %s3125_s30 = scalar_lea.hbm %s3219_s4, %s1892_s17 }
  0x19   : > { %s2334_s9 = scalar_lea.vmem %s3215_s0, %s1810_s6  ;;  %s1668_s6 = scalar_lea.sflag [#allocation3], %s3103_s12 }
  0x1a   : > { %v2337_v1 = vld [vmem:[%s2334_s9 + $0x8] sm:$0xff]  ;;  %v2340_v2 = vld [vmem:[%s2334_s9] sm:$0xff]  ;;  %v2353_v5 = vld [vmem:[%s2334_s9 + $0x70] sm:$0xff]  ;;  %s250_s10 = scalar_select %p249_p11, %s2303_s22, 3 }
  0x1b   : > { %282 = vperm.xlu1 %2028, %v2337_v1   ;;  %279 = vperm.xlu0 %2027, %v2340_v2   ;;  %v2345_v3 = vld [vmem:[%s2334_s9 + $0x68] sm:$0xff]  ;;  %v2348_v4 = vld [vmem:[%s2334_s9 + $0x60] sm:$0xff]  ;;  %v2356_v6 = vld [vmem:[%s2334_s9 + $0x10] sm:$0xff] }
  0x1c   : > { %v2361_v7 = vld [vmem:[%s2334_s9 + $0x78] sm:$0xff]  ;;  %v2369_v9 = vld [vmem:[%s2334_s9 + $0x80] sm:$0xff]  ;;  %v2377_v11 = vld [vmem:[%s2334_s9 + $0x88] sm:$0xff]  ;;  %s1811_s11 = sshll.u32 %s250_s10, 1  ;;  %s2248_s10 = smov 32  }
  0x1d   : > { %v2364_v8 = vld [vmem:[%s2334_s9 + $0x18] sm:$0xff]  ;;  %v2372_v10 = vld [vmem:[%s2334_s9 + $0x20] sm:$0xff]  ;;  %v2380_v12 = vld [vmem:[%s2334_s9 + $0x28] sm:$0xff]  ;;  %s252_s14 = scalar_lea.vmem %s3216_s1, %s1811_s11  ;;  %s2249_s11 = smov 96  }
  0x1e   : > { %v2385_v13 = vld [vmem:[%s2334_s9 + $0x90] sm:$0xff]  ;;  %v2393_v15 = vld [vmem:[%s2334_s9 + $0x98] sm:$0xff]  ;;  %v2401_v17 = vld [vmem:[%s2334_s9 + $0xa0] sm:$0xff] }
  0x1f   : > { %318 = vperm.xlu1 %2028, %v2345_v3   ;;  %315 = vperm.xlu0 %2027, %v2348_v4   ;;  %v2388_v14 = vld [vmem:[%s2334_s9 + $0x30] sm:$0xff]  ;;  %v2396_v16 = vld [vmem:[%s2334_s9 + $0x38] sm:$0xff]  ;;  %v2404_v18 = vld [vmem:[%s2334_s9 + $0x40] sm:$0xff] }
  0x20   : > { %v2409_v19 = vld [vmem:[%s2334_s9 + $0xa8] sm:$0xff]  ;;  %v2417_v21 = vld [vmem:[%s2334_s9 + $0xb0] sm:$0xff]  ;;  %v2425_v23 = vld [vmem:[%s2334_s9 + $0xb8] sm:$0xff] }
  0x21   : > { %v2412_v20 = vld [vmem:[%s2334_s9 + $0x48] sm:$0xff]  ;;  %v2420_v22 = vld [vmem:[%s2334_s9 + $0x50] sm:$0xff]  ;;  %v2428_v24 = vld [vmem:[%s2334_s9 + $0x58] sm:$0xff]  ;;  %s2153_s9 = sshll.u32 %s2250_s8, 4  ;;  %s2154_s9 = int_to_ptr.vmem [resolvable:$false] %s2153_s9 }
  0x22   : > { %v277_v29 = vld [vmem:[%s252_s14] sm:$0x3]  ;;  %s1808_s14 = sshll.u32 %s3103_s12, 4 }
  0x23   : > { %321 = vperm.xlu1 %2028, %v2353_v5   ;;  %285 = vperm.xlu0 %2027, %v2356_v6   ;;  %v2443_v30 = vrot.slane %v277_v29, %v352_v27  ;;  %v2447_v31 = vrot.slane %v277_v29, %v428_v28  ;;  %s235_s16 = scalar_lea.vmem [#allocation2], %s1808_s14 }
  0x24   : > { %s1687_s23 = sshll.u32 %s235_s16, 4  ;;  %s3127_s23 = int_to_ptr.vmem [resolvable:$true] %s1687_s23 }
  0x25   : > { %s2149_s7 = scalar_lea.vmem %s3127_s23, 256  ;;  %p2156_p1 = scmp.lt.s32.totalorder %s3127_s23, %s2154_s9 }
  0x26   : > { %p2150_p12 = scmp.ne.s32.totalorder %s3127_s23, %s2149_s7 }
  0x27   : > { %324 = vperm.xlu1 %2028, %v2361_v7   ;;  %288 = vperm.xlu0 %2027, %v2364_v8  }
  0x28   : > { %p2151_p13 = pnand %p2150_p12, %p2320_p5 }
  0x2a   : > { %p2152_p0 = pneg %p2151_p13 }
  0x2b   : > { %327 = vperm.xlu1 %2028, %v2369_v9   ;;  %291 = vperm.xlu0 %2027, %v2372_v10  }
  0x2f   : > { %330 = vperm.xlu1 %2028, %v2377_v11   ;;  %294 = vperm.xlu0 %2027, %v2380_v12  }
  0x33   : > { %333 = vperm.xlu1 %2028, %v2385_v13   ;;  %297 = vperm.xlu0 %2027, %v2388_v14  }
  0x37   : > { %336 = vperm.xlu1 %2028, %v2393_v15   ;;  %300 = vperm.xlu0 %2027, %v2396_v16  }
  0x3b   : > { %339 = vperm.xlu1 %2028, %v2401_v17   ;;  %303 = vperm.xlu0 %2027, %v2404_v18  }
  0x3f   : > { %342 = vperm.xlu1 %2028, %v2409_v19   ;;  %306 = vperm.xlu0 %2027, %v2412_v20  }
  0x43   : > { %345 = vperm.xlu1 %2028, %v2417_v21   ;;  %309 = vperm.xlu0 %2027, %v2420_v22  }
  0x47   : > { %348 = vperm.xlu1 %2028, %v2425_v23   ;;  %312 = vperm.xlu0 %2027, %v2428_v24  }
  0x9a   : > { %v283_v32 = vpop.permute.xlu1 %282  ;;  %v280_v33 = vpop.permute.xlu0 %279 }
  0x9b   : > { %vm355_vm0 = vcmp.eq.s32.totalorder %v283_v32, %v2443_v30  ;;  %vm431_vm1 = vcmp.eq.s32.totalorder %v283_v32, %v2447_v31  ;;  %vm354_vm2 = vcmp.eq.s32.totalorder %v280_v33, %v2443_v30  ;;  %vm430_vm3 = vcmp.eq.s32.totalorder %v280_v33, %v2447_v31 }
  0x9c   : > { %v2454_v35 = vsel %vm355_vm0, 1.0, %v2246_v34  ;;  %v1837_v36 = vsel %vm431_vm1, 1.0, %v2246_v34  ;;  %v2458_v37 = vsel %vm354_vm2, 1.0, %v2246_v34  ;;  %v1836_v38 = vsel %vm430_vm3, 1.0, %v2246_v34 }
  0x9d   : > { %v2029_v39 = vpack.i.bf16 %v1836_v38, %v2458_v37  ;;  %v2039_v42 = vpack.i.bf16 %v1837_v36, %v2454_v35 }
  0x9e   : > { %v319_v40 = vpop.permute.xlu1 %318  ;;  %v316_v41 = vpop.permute.xlu0 %315 }
  0x9f   : > { %vm366_vm4 = vcmp.eq.s32.totalorder %v316_v41, %v2443_v30  ;;  %vm442_vm5 = vcmp.eq.s32.totalorder %v316_v41, %v2447_v31  ;;  %2030 = vrot.lane.b32.xlu0 %v2029_v39, %s2247_s15  ;;  %vm367_vm6 = vcmp.eq.s32.totalorder %v319_v40, %v2443_v30  ;;  %vm443_vm7 = vcmp.eq.s32.totalorder %v319_v40, %v2447_v31 }
  0xa0   : > { %v2469_v43 = vsel %vm366_vm4, 1.0, %v2246_v34  ;;  %v1848_v44 = vsel %vm442_vm5, 1.0, %v2246_v34  ;;  %v2474_v48 = vsel %vm367_vm6, 1.0, %v2246_v34  ;;  %v1849_v49 = vsel %vm443_vm7, 1.0, %v2246_v34 }
  0xa1   : > { %v2034_v45 = vpack.i.bf16 %v1848_v44, %v2469_v43  ;;  %v2044_v55 = vpack.i.bf16 %v1849_v49, %v2474_v48 }
  0xa2   : > { %v322_v46 = vpop.permute.xlu1 %321  ;;  %v286_v47 = vpop.permute.xlu0 %285 }
  0xa3   : > { %vm356_vm8 = vcmp.eq.s32.totalorder %v286_v47, %v2443_v30  ;;  %vm432_vm9 = vcmp.eq.s32.totalorder %v286_v47, %v2447_v31  ;;  %2040 = vrot.lane.b32.xlu0 %v2039_v42, %s2247_s15  ;;  %vm368_vm10 = vcmp.eq.s32.totalorder %v322_v46, %v2443_v30  ;;  %vm444_vm11 = vcmp.eq.s32.totalorder %v322_v46, %v2447_v31 }
  0xa4   : > { %v2483_v50 = vsel %vm356_vm8, 1.0, %v2246_v34  ;;  %v1838_v51 = vsel %vm432_vm9, 1.0, %v2246_v34  ;;  %2035 = vrot.lane.b32.xlu1 %v2034_v45, %s2247_s15  ;;  %v2490_v56 = vsel %vm368_vm10, 1.0, %v2246_v34  ;;  %v1850_v57 = vsel %vm444_vm11, 1.0, %v2246_v34 }
  0xa5   : > { %v2049_v52 = vpack.i.bf16 %v1838_v51, %v2483_v50  ;;  %v2054_v63 = vpack.i.bf16 %v1850_v57, %v2490_v56 }
  0xa6   : > { %v325_v53 = vpop.permute.xlu1 %324  ;;  %v289_v54 = vpop.permute.xlu0 %288 }
  0xa7   : > { %vm357_vm12 = vcmp.eq.s32.totalorder %v289_v54, %v2443_v30  ;;  %vm433_vm13 = vcmp.eq.s32.totalorder %v289_v54, %v2447_v31  ;;  %2050 = vrot.lane.b32.xlu0 %v2049_v52, %s2247_s15  ;;  %vm369_vm14 = vcmp.eq.s32.totalorder %v325_v53, %v2443_v30  ;;  %vm445_vm15 = vcmp.eq.s32.totalorder %v325_v53, %v2447_v31 }
  0xa8   : > { %v2499_v58 = vsel %vm357_vm12, 1.0, %v2246_v34  ;;  %v1839_v59 = vsel %vm433_vm13, 1.0, %v2246_v34  ;;  %2045 = vrot.lane.b32.xlu1 %v2044_v55, %s2247_s15  ;;  %v2506_v0 = vsel %vm369_vm14, 1.0, %v2246_v34  ;;  %v1851_v25 = vsel %vm445_vm15, 1.0, %v2246_v34 }
  0xa9   : > { %v2059_v60 = vpack.i.bf16 %v1839_v59, %v2499_v58  ;;  %v2064_v39 = vpack.i.bf16 %v1851_v25, %v2506_v0 }
  0xaa   : > { %v328_v61 = vpop.permute.xlu1 %327  ;;  %v292_v62 = vpop.permute.xlu0 %291 }
  0xab   : > { %vm358_vm0 = vcmp.eq.s32.totalorder %v292_v62, %v2443_v30  ;;  %vm434_vm1 = vcmp.eq.s32.totalorder %v292_v62, %v2447_v31  ;;  %2060 = vrot.lane.b32.xlu0 %v2059_v60, %s2247_s15  ;;  %vm370_vm2 = vcmp.eq.s32.totalorder %v328_v61, %v2443_v30  ;;  %vm446_vm3 = vcmp.eq.s32.totalorder %v328_v61, %v2447_v31 }
  0xac   : > { %v2515_v29 = vsel %vm358_vm0, 1.0, %v2246_v34  ;;  %v1840_v32 = vsel %vm434_vm1, 1.0, %v2246_v34  ;;  %2055 = vrot.lane.b32.xlu1 %v2054_v63, %s2247_s15  ;;  %v2522_v40 = vsel %vm370_vm2, 1.0, %v2246_v34  ;;  %v1852_v41 = vsel %vm446_vm3, 1.0, %v2246_v34 }
  0xad   : > { %v2069_v33 = vpack.i.bf16 %v1840_v32, %v2515_v29  ;;  %v2074_v49 = vpack.i.bf16 %v1852_v41, %v2522_v40 }
  0xae   : > { %v331_v36 = vpop.permute.xlu1 %330  ;;  %v295_v38 = vpop.permute.xlu0 %294 }
  0xaf   : > { %vm359_vm4 = vcmp.eq.s32.totalorder %v295_v38, %v2443_v30  ;;  %vm435_vm5 = vcmp.eq.s32.totalorder %v295_v38, %v2447_v31  ;;  %2070 = vrot.lane.b32.xlu0 %v2069_v33, %s2247_s15  ;;  %vm371_vm6 = vcmp.eq.s32.totalorder %v331_v36, %v2443_v30  ;;  %vm447_vm7 = vcmp.eq.s32.totalorder %v331_v36, %v2447_v31 }
  0xb0   : > { %v2531_v42 = vsel %vm359_vm4, 1.0, %v2246_v34  ;;  %v1841_v44 = vsel %vm435_vm5, 1.0, %v2246_v34  ;;  %2065 = vrot.lane.b32.xlu1 %v2064_v39, %s2247_s15  ;;  %v2538_v51 = vsel %vm371_vm6, 1.0, %v2246_v34  ;;  %v1853_v52 = vsel %vm447_vm7, 1.0, %v2246_v34 }
  0xb1   : > { %v2079_v45 = vpack.i.bf16 %v1841_v44, %v2531_v42  ;;  %v2084_v60 = vpack.i.bf16 %v1853_v52, %v2538_v51 }
  0xb2   : > { %v334_v46 = vpop.permute.xlu1 %333  ;;  %v298_v47 = vpop.permute.xlu0 %297 }
  0xb3   : > { %vm360_vm8 = vcmp.eq.s32.totalorder %v298_v47, %v2443_v30  ;;  %vm436_vm9 = vcmp.eq.s32.totalorder %v298_v47, %v2447_v31  ;;  %2080 = vrot.lane.b32.xlu0 %v2079_v45, %s2247_s15  ;;  %vm372_vm10 = vcmp.eq.s32.totalorder %v334_v46, %v2443_v30  ;;  %vm448_vm11 = vcmp.eq.s32.totalorder %v334_v46, %v2447_v31 }
  0xb4   : > { %v2547_v53 = vsel %vm360_vm8, 1.0, %v2246_v34  ;;  %v1842_v54 = vsel %vm436_vm9, 1.0, %v2246_v34  ;;  %2075 = vrot.lane.b32.xlu1 %v2074_v49, %s2247_s15  ;;  %v2554_v61 = vsel %vm372_vm10, 1.0, %v2246_v34  ;;  %v1854_v62 = vsel %vm448_vm11, 1.0, %v2246_v34 }
  0xb5   : > { %v2089_v55 = vpack.i.bf16 %v1842_v54, %v2547_v53  ;;  %v2094_v38 = vpack.i.bf16 %v1854_v62, %v2554_v61 }
  0xb6   : > { %v337_v57 = vpop.permute.xlu1 %336  ;;  %v301_v59 = vpop.permute.xlu0 %300 }
  0xb7   : > { %vm361_vm12 = vcmp.eq.s32.totalorder %v301_v59, %v2443_v30  ;;  %vm437_vm13 = vcmp.eq.s32.totalorder %v301_v59, %v2447_v31  ;;  %2090 = vrot.lane.b32.xlu0 %v2089_v55, %s2247_s15  ;;  %vm373_vm14 = vcmp.eq.s32.totalorder %v337_v57, %v2443_v30  ;;  %vm449_vm15 = vcmp.eq.s32.totalorder %v337_v57, %v2447_v31 }
  0xb8   : > { %v2563_v63 = vsel %vm361_vm12, 1.0, %v2246_v34  ;;  %v1843_v25 = vsel %vm437_vm13, 1.0, %v2246_v34  ;;  %2085 = vrot.lane.b32.xlu1 %v2084_v60, %s2247_s15  ;;  %v2570_v39 = vsel %vm373_vm14, 1.0, %v2246_v34  ;;  %v1855_v41 = vsel %vm449_vm15, 1.0, %v2246_v34 }
  0xb9   : > { %v2099_v32 = vpack.i.bf16 %v1843_v25, %v2563_v63  ;;  %v2104_v52 = vpack.i.bf16 %v1855_v41, %v2570_v39 }
  0xba   : > { %v340_v33 = vpop.permute.xlu1 %339  ;;  %v304_v36 = vpop.permute.xlu0 %303 }
  0xbb   : > { %vm362_vm0 = vcmp.eq.s32.totalorder %v304_v36, %v2443_v30  ;;  %vm438_vm1 = vcmp.eq.s32.totalorder %v304_v36, %v2447_v31  ;;  %2100 = vrot.lane.b32.xlu0 %v2099_v32, %s2247_s15  ;;  %vm374_vm2 = vcmp.eq.s32.totalorder %v340_v33, %v2443_v30  ;;  %vm450_vm3 = vcmp.eq.s32.totalorder %v340_v33, %v2447_v31 }
  0xbc   : > { %v2579_v44 = vsel %vm362_vm0, 1.0, %v2246_v34  ;;  %v1844_v45 = vsel %vm438_vm1, 1.0, %v2246_v34  ;;  %2095 = vrot.lane.b32.xlu1 %v2094_v38, %s2247_s15  ;;  %v2586_v54 = vsel %vm374_vm2, 1.0, %v2246_v34  ;;  %v1856_v55 = vsel %vm450_vm3, 1.0, %v2246_v34 }
  0xbd   : > { %v2109_v46 = vpack.i.bf16 %v1844_v45, %v2579_v44  ;;  %v2114_v32 = vpack.i.bf16 %v1856_v55, %v2586_v54  ;;  %vm3221_vm0 = vcmask 523264   ;;  %vm815_vm1 = vcmp.ge.s32.totalorder %v2340_v2, 8 }
  0xbe   : > { %v343_v47 = vpop.permute.xlu1 %342  ;;  %v307_v49 = vpop.permute.xlu0 %306  ;;  %vm828_vm2 = vcmp.ge.s32.totalorder %v2345_v3, 8  ;;  %vm829_vm3 = vcmp.ge.s32.totalorder %v2353_v5, 8  ;;  %v1307_v3 = vld [vmem:[%s3218_s3 + $0x18] sm:$0xff] }
  0xbf   : > { %vm363_vm4 = vcmp.eq.s32.totalorder %v307_v49, %v2443_v30  ;;  %vm439_vm5 = vcmp.eq.s32.totalorder %v307_v49, %v2447_v31  ;;  %2110 = vrot.lane.b32.xlu0 %v2109_v46, %s2247_s15  ;;  %vm375_vm6 = vcmp.eq.s32.totalorder %v343_v47, %v2443_v30  ;;  %vm451_vm7 = vcmp.eq.s32.totalorder %v343_v47, %v2447_v31 }
  0xc0   : > { %v2595_v57 = vsel %vm363_vm4, 1.0, %v2246_v34  ;;  %v1845_v59 = vsel %vm439_vm5, 1.0, %v2246_v34  ;;  %2105 = vrot.lane.b32.xlu1 %v2104_v52, %s2247_s15  ;;  %v2602_v33 = vsel %vm375_vm6, 1.0, %v2246_v34  ;;  %v1857_v36 = vsel %vm451_vm7, 1.0, %v2246_v34 }
  0xc1   : > { %v2119_v60 = vpack.i.bf16 %v1845_v59, %v2595_v57  ;;  %v2124_v49 = vpack.i.bf16 %v1857_v36, %v2602_v33  ;;  %vm827_vm4 = vcmp.ge.s32.totalorder %v2348_v4, 8  ;;  %vm830_vm5 = vcmp.ge.s32.totalorder %v2361_v7, 8 }
  0xc2   : > { %v346_v62 = vpop.permute.xlu1 %345  ;;  %v310_v25 = vpop.permute.xlu0 %309  ;;  %vm816_vm6 = vcmp.ge.s32.totalorder %v2337_v1, 8  ;;  %vm831_vm7 = vcmp.ge.s32.totalorder %v2369_v9, 8 }
  0xc3   : > { %vm364_vm8 = vcmp.eq.s32.totalorder %v310_v25, %v2443_v30  ;;  %vm440_vm9 = vcmp.eq.s32.totalorder %v310_v25, %v2447_v31  ;;  %2120 = vrot.lane.b32.xlu0 %v2119_v60, %s2247_s15  ;;  %vm376_vm10 = vcmp.eq.s32.totalorder %v346_v62, %v2443_v30  ;;  %vm452_vm11 = vcmp.eq.s32.totalorder %v346_v62, %v2447_v31 }
  0xc4   : > { %v2611_v38 = vsel %vm364_vm8, 1.0, %v2246_v34  ;;  %v1846_v41 = vsel %vm440_vm9, 1.0, %v2246_v34  ;;  %2115 = vrot.lane.b32.xlu1 %v2114_v32, %s2247_s15  ;;  %v1834_v52 = vsel %vm376_vm10, 1.0, %v2246_v34  ;;  %v1858_v55 = vsel %vm452_vm11, 1.0, %v2246_v34 }
  0xc5   : > { %v2129_v45 = vpack.i.bf16 %v1846_v41, %v2611_v38  ;;  %v2134_v25 = vpack.i.bf16 %v1858_v55, %v1834_v52  ;;  %v542_v41 = vsel %vm3221_vm0, %v2474_v48, 0.0  ;;  %v551_v48 = vsel %vm3221_vm0, %v2522_v40, 0.0 }
  0xc6   : > { %v349_v46 = vpop.permute.xlu1 %348  ;;  %v313_v47 = vpop.permute.xlu0 %312  ;;  %v515_v40 = vsel %vm3221_vm0, %v2515_v29, 0.0  ;;  %v566_v29 = vsel %vm3221_vm0, %v2602_v33, 0.0  ;;  %v530_v33 = vsel %vm3221_vm0, %v2595_v57, 0.0  ;;  %vm817_vm8 = vcmp.ge.s32.totalorder %v2356_v6, 8 }
  0xc7   : > { %vm365_vm12 = vcmp.eq.s32.totalorder %v313_v47, %v2443_v30  ;;  %vm441_vm13 = vcmp.eq.s32.totalorder %v313_v47, %v2447_v31  ;;  %2130 = vrot.lane.b32.xlu0 %v2129_v45, %s2247_s15  ;;  %vm377_vm14 = vcmp.eq.s32.totalorder %v349_v46, %v2443_v30  ;;  %vm453_vm15 = vcmp.eq.s32.totalorder %v349_v46, %v2447_v31 }
  0xc8   : > { %v2625_v59 = vsel %vm365_vm12, 1.0, %v2246_v34  ;;  %v1847_v60 = vsel %vm441_vm13, 1.0, %v2246_v34  ;;  %2125 = vrot.lane.b32.xlu1 %v2124_v49, %s2247_s15  ;;  %v1835_v32 = vsel %vm377_vm14, 1.0, %v2246_v34  ;;  %v1859_v36 = vsel %vm453_vm15, 1.0, %v2246_v34 }
  0xc9   : > { %v2139_v62 = vpack.i.bf16 %v1847_v60, %v2625_v59  ;;  %v2144_v30 = vpack.i.bf16 %v1859_v36, %v1835_v32  ;;  %v503_v31 = vsel %vm3221_vm0, %v2458_v37, 0.0  ;;  %v545_v45 = vsel %vm3221_vm0, %v2490_v56, 0.0 }
  0xca   : > { %v539_v34 = vsel %vm3221_vm0, %v2469_v43, 0.0  ;;  %v548_v46 = vsel %vm3221_vm0, %v2506_v0, 0.0  ;;  %v506_v37 = vsel %vm3221_vm0, %v2454_v35, 0.0  ;;  %v509_v56 = vsel %vm3221_vm0, %v2483_v50, 0.0 }
  0xcb   : > { %2140 = vrot.lane.b32.xlu0 %v2139_v62, %s2247_s15  ;;  %v554_v43 = vsel %vm3221_vm0, %v2538_v51, 0.0  ;;  %v512_v0 = vsel %vm3221_vm0, %v2499_v58, 0.0  ;;  %v557_v35 = vsel %vm3221_vm0, %v2554_v61, 0.0  ;;  %v560_v50 = vsel %vm3221_vm0, %v2570_v39, 0.0 }
  0xcc   : > { %2135 = vrot.lane.b32.xlu1 %v2134_v25, %s2247_s15  ;;  %v518_v51 = vsel %vm3221_vm0, %v2531_v42, 0.0  ;;  %v563_v58 = vsel %vm3221_vm0, %v2586_v54, 0.0  ;;  %v521_v61 = vsel %vm3221_vm0, %v2547_v53, 0.0  ;;  %v524_v39 = vsel %vm3221_vm0, %v2563_v63, 0.0 }
  0xcd   : > { %v569_v42 = vsel %vm3221_vm0, %v1834_v52, 0.0  ;;  %v527_v54 = vsel %vm3221_vm0, %v2579_v44, 0.0  ;;  %v572_v60 = vsel %vm3221_vm0, %v1835_v32, 0.0  ;;  %v533_v44 = vsel %vm3221_vm0, %v2611_v38, 0.0 }
  0xce   : > { %vm832_vm9 = vcmp.ge.s32.totalorder %v2377_v11, 8  ;;  %vm818_vm10 = vcmp.ge.s32.totalorder %v2364_v8, 8  ;;  %vm3222_vm11 = vcmp.ge.s32.totalorder %v2385_v13, 8  ;;  %vm819_vm12 = vcmp.ge.s32.totalorder %v2372_v10, 8 }
  0xcf   : > { %vm3223_vm13 = vcmp.ge.s32.totalorder %v2393_v15, 8  ;;  %vm3224_vm14 = vcmp.ge.s32.totalorder %v2380_v12, 8  ;;  %vm3225_vm15 = vcmp.ge.s32.totalorder %v2401_v17, 8 }
  0xd0   : > { %2145 = vrot.lane.b32.xlu1 %v2144_v30, %s2247_s15 }
  0xea   : > { %504 = vadd.xlane.f32.xlu0 %v503_v31 }
  0xee   : > { %543 = vadd.xlane.f32.xlu0 %v542_v41 }
  0xf2   : > { %546 = vadd.xlane.f32.xlu0 %v545_v45 }
  0xf4   : > { %540 = vadd.xlane.f32.xlu1 %v539_v34 }
  0xf6   : > { %549 = vadd.xlane.f32.xlu0 %v548_v46 }
  0xf8   : > { %507 = vadd.xlane.f32.xlu1 %v506_v37  ;;  %v536_v37 = vsel %vm3221_vm0, %v2625_v59, 0.0 }
  0xfa   : > { %552 = vadd.xlane.f32.xlu0 %v551_v48 }
  0xfc   : > { %510 = vadd.xlane.f32.xlu1 %v509_v56 }
  0xfe   : > { %555 = vadd.xlane.f32.xlu0 %v554_v43 }
 0x100   : > { %513 = vadd.xlane.f32.xlu1 %v512_v0 }
 0x102   : > { %558 = vadd.xlane.f32.xlu0 %v557_v35 }
 0x104   : > { %516 = vadd.xlane.f32.xlu1 %v515_v40 }
 0x106   : > { %561 = vadd.xlane.f32.xlu0 %v560_v50 }
 0x108   : > { %519 = vadd.xlane.f32.xlu1 %v518_v51 }
 0x10a   : > { %564 = vadd.xlane.f32.xlu0 %v563_v58 }
 0x10c   : > { %522 = vadd.xlane.f32.xlu1 %v521_v61 }
 0x10e   : > { %567 = vadd.xlane.f32.xlu0 %v566_v29 }
 0x110   : > { %525 = vadd.xlane.f32.xlu1 %v524_v39 }
 0x111   : > { %v2031_v47 = vpop.permute.xlu0 %2030 }
 0x112   : > { %570 = vadd.xlane.f32.xlu0 %v569_v42  ;;  %v2033_v49 = vunpack.i.h.bf16 %v2031_v47  ;;  %v2032_v55 = vunpack.i.l.bf16 %v2031_v47 }
 0x114   : > { %528 = vadd.xlane.f32.xlu1 %v527_v54  ;;  %v719_v52 = vsel %vm3221_vm0, %v2032_v55, %v2033_v49 }
 0x115   : > { %v2041_v53 = vpop.permute.xlu0 %2040 }
 0x116   : > { %v2036_v62 = vpop.permute.xlu1 %2035  ;;  %573 = vadd.xlane.f32.xlu0 %v572_v60  ;;  %v2043_v57 = vunpack.i.h.bf16 %v2041_v53  ;;  %v2042_v46 = vunpack.i.l.bf16 %v2041_v53 }
 0x117   : > { %v2038_v63 = vunpack.i.h.bf16 %v2036_v62  ;;  %v2037_v25 = vunpack.i.l.bf16 %v2036_v62 }
 0x118   : > { %531 = vadd.xlane.f32.xlu1 %v530_v33  ;;  %v720_v50 = vsel %vm3221_vm0, %v2042_v46, %v2043_v57 }
 0x119   : > { %v2051_v36 = vpop.permute.xlu0 %2050  ;;  %v731_v45 = vsel %vm3221_vm0, %v2037_v25, %v2038_v63 }
 0x11a   : > { %v2046_v30 = vpop.permute.xlu1 %2045  ;;  %767 = vadd.xlane.f32.xlu0 %v719_v52  ;;  %v2053_v35 = vunpack.i.h.bf16 %v2051_v36  ;;  %v2052_v40 = vunpack.i.l.bf16 %v2051_v36 }
 0x11b   : > { %v2048_v31 = vunpack.i.h.bf16 %v2046_v30  ;;  %v2047_v41 = vunpack.i.l.bf16 %v2046_v30 }
 0x11c   : > { %534 = vadd.xlane.f32.xlu1 %v533_v44  ;;  %v721_v42 = vsel %vm3221_vm0, %v2052_v40, %v2053_v35 }
 0x11d   : > { %v2061_v32 = vpop.permute.xlu0 %2060  ;;  %v732_v0 = vsel %vm3221_vm0, %v2047_v41, %v2048_v31 }
 0x11e   : > { %v2056_v34 = vpop.permute.xlu1 %2055  ;;  %791 = vadd.xlane.f32.xlu0 %v731_v45  ;;  %v2063_v59 = vunpack.i.h.bf16 %v2061_v32  ;;  %v2062_v47 = vunpack.i.l.bf16 %v2061_v32 }
 0x11f   : > { %v2058_v48 = vunpack.i.h.bf16 %v2056_v34  ;;  %v2057_v56 = vunpack.i.l.bf16 %v2056_v34 }
 0x120   : > { %537 = vadd.xlane.f32.xlu1 %v536_v37  ;;  %v722_v63 = vsel %vm3221_vm0, %v2062_v47, %v2063_v59 }
 0x121   : > { %v2071_v43 = vpop.permute.xlu0 %2070  ;;  %v733_v29 = vsel %vm3221_vm0, %v2057_v56, %v2058_v48 }
 0x122   : > { %v2066_v38 = vpop.permute.xlu1 %2065  ;;  %793 = vadd.xlane.f32.xlu0 %v732_v0  ;;  %v2073_v62 = vunpack.i.h.bf16 %v2071_v43  ;;  %v2072_v33 = vunpack.i.l.bf16 %v2071_v43 }
 0x123   : > { %v2068_v51 = vunpack.i.h.bf16 %v2066_v38  ;;  %v2067_v58 = vunpack.i.l.bf16 %v2066_v38 }
 0x124   : > { %769 = vadd.xlane.f32.xlu1 %v720_v50  ;;  %v723_v32 = vsel %vm3221_vm0, %v2072_v33, %v2073_v62 }
 0x125   : > { %v2081_v61 = vpop.permute.xlu0 %2080  ;;  %v734_v53 = vsel %vm3221_vm0, %v2067_v58, %v2068_v51 }
 0x126   : > { %v2076_v39 = vpop.permute.xlu1 %2075  ;;  %795 = vadd.xlane.f32.xlu0 %v733_v29  ;;  %v2083_v31 = vunpack.i.h.bf16 %v2081_v61  ;;  %v2082_v41 = vunpack.i.l.bf16 %v2081_v61 }
 0x127   : > { %v2078_v54 = vunpack.i.h.bf16 %v2076_v39  ;;  %v2077_v49 = vunpack.i.l.bf16 %v2076_v39 }
 0x128   : > { %771 = vadd.xlane.f32.xlu1 %v721_v42  ;;  %v724_v43 = vsel %vm3221_vm0, %v2082_v41, %v2083_v31 }
 0x129   : > { %v2091_v55 = vpop.permute.xlu0 %2090  ;;  %v735_v30 = vsel %vm3221_vm0, %v2077_v49, %v2078_v54 }
 0x12a   : > { %v2086_v60 = vpop.permute.xlu1 %2085  ;;  %797 = vadd.xlane.f32.xlu0 %v734_v53  ;;  %v2093_v48 = vunpack.i.h.bf16 %v2091_v55  ;;  %v2092_v56 = vunpack.i.l.bf16 %v2091_v55 }
 0x12b   : > { %v2088_v25 = vunpack.i.h.bf16 %v2086_v60  ;;  %v2087_v36 = vunpack.i.l.bf16 %v2086_v60 }
 0x12c   : > { %773 = vadd.xlane.f32.xlu1 %v722_v63  ;;  %v725_v58 = vsel %vm3221_vm0, %v2092_v56, %v2093_v48 }
 0x12d   : > { %v2101_v52 = vpop.permute.xlu0 %2100  ;;  %v736_v57 = vsel %vm3221_vm0, %v2087_v36, %v2088_v25 }
 0x12e   : > { %v2096_v44 = vpop.permute.xlu1 %2095  ;;  %799 = vadd.xlane.f32.xlu0 %v735_v30  ;;  %v2103_v50 = vunpack.i.h.bf16 %v2101_v52  ;;  %v2102_v51 = vunpack.i.l.bf16 %v2101_v52 }
 0x12f   : > { %v2098_v45 = vunpack.i.h.bf16 %v2096_v44  ;;  %v2097_v34 = vunpack.i.l.bf16 %v2096_v44 }
 0x130   : > { %775 = vadd.xlane.f32.xlu1 %v723_v32  ;;  %v726_v49 = vsel %vm3221_vm0, %v2102_v51, %v2103_v50 }
 0x131   : > { %v2111_v37 = vpop.permute.xlu0 %2110  ;;  %v737_v35 = vsel %vm3221_vm0, %v2097_v34, %v2098_v45 }
 0x132   : > { %v2106_v46 = vpop.permute.xlu1 %2105  ;;  %801 = vadd.xlane.f32.xlu0 %v736_v57  ;;  %v2113_v42 = vunpack.i.h.bf16 %v2111_v37  ;;  %v2112_v54 = vunpack.i.l.bf16 %v2111_v37 }
 0x133   : > { %v2108_v0 = vunpack.i.h.bf16 %v2106_v46  ;;  %v2107_v38 = vunpack.i.l.bf16 %v2106_v46 }
 0x134   : > { %777 = vadd.xlane.f32.xlu1 %v724_v43  ;;  %v727_v36 = vsel %vm3221_vm0, %v2112_v54, %v2113_v42 }
 0x135   : > { %v2121_v61 = vpop.permute.xlu0 %2120  ;;  %v738_v59 = vsel %vm3221_vm0, %v2107_v38, %v2108_v0 }
 0x136   : > { %v2116_v40 = vpop.permute.xlu1 %2115  ;;  %803 = vadd.xlane.f32.xlu0 %v737_v35  ;;  %v2123_v63 = vunpack.i.h.bf16 %v2121_v61  ;;  %v2122_v25 = vunpack.i.l.bf16 %v2121_v61 }
 0x137   : > { %v2118_v29 = vunpack.i.h.bf16 %v2116_v40  ;;  %v2117_v39 = vunpack.i.l.bf16 %v2116_v40 }
 0x138   : > { %779 = vadd.xlane.f32.xlu1 %v725_v58  ;;  %v728_v45 = vsel %vm3221_vm0, %v2122_v25, %v2123_v63 }
 0x139   : > { %v739_v60 = vsel %vm3221_vm0, %v2117_v39, %v2118_v29  ;;  %v2131_v62 = vpop.permute.xlu0 %2130 }
 0x13a   : > { %v2126_v47 = vpop.permute.xlu1 %2125  ;;  %805 = vadd.xlane.f32.xlu0 %v738_v59  ;;  %v2133_v41 = vunpack.i.h.bf16 %v2131_v62  ;;  %v2132_v32 = vunpack.i.l.bf16 %v2131_v62 }
 0x13b   : > { %v2128_v55 = vunpack.i.h.bf16 %v2126_v47  ;;  %v2127_v53 = vunpack.i.l.bf16 %v2126_v47 }
 0x13c   : > { %781 = vadd.xlane.f32.xlu1 %v726_v49  ;;  %v729_v43 = vsel %vm3221_vm0, %v2132_v32, %v2133_v41 }
 0x13d   : > { %v740_v44 = vsel %vm3221_vm0, %v2127_v53, %v2128_v55  ;;  %v2141_v34 = vpop.permute.xlu0 %2140 }
 0x13e   : > { %v2136_v33 = vpop.permute.xlu1 %2135  ;;  %807 = vadd.xlane.f32.xlu0 %v739_v60  ;;  %v2143_v48 = vunpack.i.h.bf16 %v2141_v34  ;;  %v2142_v56 = vunpack.i.l.bf16 %v2141_v34 }
 0x13f   : > { %v2138_v52 = vunpack.i.h.bf16 %v2136_v33  ;;  %v2137_v30 = vunpack.i.l.bf16 %v2136_v33 }
 0x140   : > { %783 = vadd.xlane.f32.xlu1 %v727_v36  ;;  %v730_v38 = vsel %vm3221_vm0, %v2142_v56, %v2143_v48 }
 0x141   : > { %v741_v37 = vsel %vm3221_vm0, %v2137_v30, %v2138_v52 }
 0x142   : > { %v2146_v31 = vpop.permute.xlu1 %2145  ;;  %809 = vadd.xlane.f32.xlu0 %v740_v44 }
 0x143   : > { %v2148_v57 = vunpack.i.h.bf16 %v2146_v31  ;;  %v2147_v46 = vunpack.i.l.bf16 %v2146_v31 }
 0x144   : > { %785 = vadd.xlane.f32.xlu1 %v728_v45 }
 0x145   : > { %v742_v0 = vsel %vm3221_vm0, %v2147_v46, %v2148_v57  ;;  %vm3226_vm0 = vcmp.ge.s32.totalorder %v2388_v14, 8 }
 0x146   : > { %811 = vadd.xlane.f32.xlu0 %v741_v37 }
 0x148   : > { %787 = vadd.xlane.f32.xlu1 %v729_v43 }
 0x14a   : > { %813 = vadd.xlane.f32.xlu0 %v742_v0 }
 0x14c   : > { %789 = vadd.xlane.f32.xlu1 %v730_v38 }
 0x177   : > { %v505_v35 = vpop.xlane.xlu0 %504 }
 0x178   : > { %v839_v40 = vsel %vm815_vm1, %v505_v35, 0.0 }
 0x179   : > { %890 = vperm.xlu1 %2028, %v839_v40  }
 0x17b   : > { %v544_v50 = vpop.xlane.xlu0 %543 }
 0x17c   : > { %v852_v51 = vsel %vm828_vm2, %v544_v50, 0.0 }
 0x17d   : > { %955 = vperm.xlu1 %2028, %v852_v51  }
 0x17f   : > { %v547_v58 = vpop.xlane.xlu0 %546 }
 0x180   : > { %v853_v61 = vsel %vm829_vm3, %v547_v58, 0.0 }
 0x181   : > { %v541_v29 = vpop.xlane.xlu1 %540  ;;  %960 = vperm.xlu1 %2028, %v853_v61  }
 0x182   : > { %v851_v39 = vsel %vm827_vm4, %v541_v29, 0.0 }
 0x183   : > { %950 = vperm.xlu0 %2027, %v851_v39   ;;  %v550_v59 = vpop.xlane.xlu0 %549 }
 0x184   : > { %v854_v47 = vsel %vm830_vm5, %v550_v59, 0.0 }
 0x185   : > { %v508_v42 = vpop.xlane.xlu1 %507  ;;  %965 = vperm.xlu1 %2028, %v854_v47  }
 0x186   : > { %v840_v54 = vsel %vm816_vm6, %v508_v42, 0.0 }
 0x187   : > { %895 = vperm.xlu0 %2027, %v840_v54   ;;  %v553_v49 = vpop.xlane.xlu0 %552 }
 0x188   : > { %v855_v55 = vsel %vm831_vm7, %v553_v49, 0.0 }
 0x189   : > { %v511_v53 = vpop.xlane.xlu1 %510  ;;  %970 = vperm.xlu1 %2028, %v855_v55  }
 0x18a   : > { %v841_v60 = vsel %vm817_vm8, %v511_v53, 0.0 }
 0x18b   : > { %900 = vperm.xlu0 %2027, %v841_v60   ;;  %v556_v62 = vpop.xlane.xlu0 %555  ;;  %v1304_v60 = vld [vmem:[%s3218_s3] sm:$0xff] }
 0x18c   : > { %v856_v33 = vsel %vm832_vm9, %v556_v62, 0.0  ;;  %v1305_v62 = vld [vmem:[%s3218_s3 + $0x8] sm:$0xff] }
 0x18d   : > { %v514_v63 = vpop.xlane.xlu1 %513  ;;  %975 = vperm.xlu1 %2028, %v856_v33   ;;  %v1966_v4 = vpack.c.bf16 %v1305_v62, %v1304_v60 }
 0x18e   : > { %v842_v25 = vsel %vm818_vm10, %v514_v63, 0.0 }
 0x18f   : > { %905 = vperm.xlu0 %2027, %v842_v25   ;;  %v559_v36 = vpop.xlane.xlu0 %558  ;;  %1974 = vmatprep.subr.bf16.mxu1 %v1966_v4 }
 0x190   : > { %v857_v52 = vsel %vm3222_vm11, %v559_v36, 0.0  ;;  %vm3227_vm11 = vcmp.ge.s32.totalorder %v2409_v19, 8  ;;  %1967 = vmatprep.subr.bf16.mxu0 %v1966_v4  ;;  %1976 = vmatpush3.bf16.msra.mxu1 %v1966_v4 }
 0x191   : > { %v517_v30 = vpop.xlane.xlu1 %516  ;;  %980 = vperm.xlu1 %2028, %v857_v52   ;;  %v1306_v52 = vld [vmem:[%s3218_s3 + $0x10] sm:$0xff]  ;;  %1969 = vmatpush3.bf16.msra.mxu0 %v1966_v4 }
 0x192   : > { %v843_v44 = vsel %vm819_vm12, %v517_v30, 0.0 }
 0x193   : > { %910 = vperm.xlu0 %2027, %v843_v44   ;;  %v562_v31 = vpop.xlane.xlu0 %561  ;;  %v1970_v44 = vpack.c.bf16 %v1307_v3, %v1306_v52 }
 0x194   : > { %v858_v41 = vsel %vm3223_vm13, %v562_v31, 0.0  ;;  %vm822_vm13 = vcmp.ge.s32.totalorder %v2396_v16, 8 }
 0x195   : > { %v520_v32 = vpop.xlane.xlu1 %519  ;;  %985 = vperm.xlu1 %2028, %v858_v41   ;;  %1975 = vmatprep.subr.bf16.mxu1 %v1970_v44 }
 0x196   : > { %v844_v45 = vsel %vm3224_vm14, %v520_v32, 0.0  ;;  %vm3228_vm14 = vcmp.ge.s32.totalorder %v2417_v21, 8  ;;  %1971 = vmatprep.subr.bf16.mxu0 %v1970_v44  ;;  %1977 = vmatpush3.bf16.msra.mxu1 %v1970_v44 }
 0x197   : > { %915 = vperm.xlu0 %2027, %v844_v45   ;;  %v565_v34 = vpop.xlane.xlu0 %564  ;;  %1973 = vmatpush3.bf16.msra.mxu0 %v1970_v44 }
 0x198   : > { %v859_v57 = vsel %vm3225_vm15, %v565_v34, 0.0  ;;  %vm823_vm15 = vcmp.ge.s32.totalorder %v2404_v18, 8 }
 0x199   : > { %v523_v46 = vpop.xlane.xlu1 %522  ;;  %990 = vperm.xlu1 %2028, %v859_v57  }
 0x19a   : > { %v845_v37 = vsel %vm3226_vm0, %v523_v46, 0.0  ;;  %vm3229_vm0 = vcmp.ge.s32.totalorder %v2425_v23, 8 }
 0x19b   : > { %920 = vperm.xlu0 %2027, %v845_v37   ;;  %v568_v48 = vpop.xlane.xlu0 %567 }
 0x19c   : > { %v860_v56 = vsel %vm3227_vm11, %v568_v48, 0.0  ;;  %vm824_vm11 = vcmp.ge.s32.totalorder %v2412_v20, 8 }
 0x19d   : > { %v526_v43 = vpop.xlane.xlu1 %525  ;;  %995 = vperm.xlu1 %2028, %v860_v56  }
 0x19e   : > { %v846_v0 = vsel %vm822_vm13, %v526_v43, 0.0 }
 0x19f   : > { %925 = vperm.xlu0 %2027, %v846_v0   ;;  %v571_v38 = vpop.xlane.xlu0 %570 }
 0x1a0   : > { %v861_v35 = vsel %vm3228_vm14, %v571_v38, 0.0  ;;  %vm825_vm14 = vcmp.ge.s32.totalorder %v2420_v22, 8 }
 0x1a1   : > { %v529_v40 = vpop.xlane.xlu1 %528  ;;  %1000 = vperm.xlu1 %2028, %v861_v35  }
 0x1a2   : > { %v847_v50 = vsel %vm823_vm15, %v529_v40, 0.0 }
 0x1a3   : > { %930 = vperm.xlu0 %2027, %v847_v50   ;;  %v574_v51 = vpop.xlane.xlu0 %573 }
 0x1a4   : > { %v862_v58 = vsel %vm3229_vm0, %v574_v51, 0.0  ;;  %vm826_vm0 = vcmp.ge.s32.totalorder %v2428_v24, 8 }
 0x1a5   : > { %v532_v61 = vpop.xlane.xlu1 %531  ;;  %1005 = vperm.xlu1 %2028, %v862_v58  }
 0x1a6   : > { %v848_v29 = vsel %vm824_vm11, %v532_v61, 0.0 }
 0x1a7   : > { %935 = vperm.xlu0 %2027, %v848_v29   ;;  %v768_v39 = vpop.xlane.xlu0 %767 }
 0x1a8   : > { %v863_v59 = vsel %vm815_vm1, %v768_v39, 0.0  ;;  %vm3232_vm1 = vcmp.ge.s32.totalorder %v2380_v12, 8 }
 0x1a9   : > { %v535_v47 = vpop.xlane.xlu1 %534  ;;  %1090 = vperm.xlu1 %2028, %v863_v59  }
 0x1aa   : > { %v849_v42 = vsel %vm825_vm14, %v535_v47, 0.0 }
 0x1ab   : > { %940 = vperm.xlu0 %2027, %v849_v42   ;;  %v792_v54 = vpop.xlane.xlu0 %791 }
 0x1ac   : > { %v875_v49 = vsel %vm827_vm4, %v792_v54, 0.0  ;;  %vm3235_vm4 = vcmp.ge.s32.totalorder %v2393_v15, 8 }
 0x1ad   : > { %v538_v55 = vpop.xlane.xlu1 %537  ;;  %1150 = vperm.xlu1 %2028, %v875_v49  }
 0x1ae   : > { %v850_v53 = vsel %vm826_vm0, %v538_v55, 0.0 }
 0x1af   : > { %945 = vperm.xlu0 %2027, %v850_v53   ;;  %v794_v2 = vpop.xlane.xlu0 %793 }
 0x1b0   : > { %v876_v33 = vsel %vm828_vm2, %v794_v2, 0.0  ;;  %vm3233_vm2 = vcmp.ge.s32.totalorder %v2385_v13, 8 }
 0x1b1   : > { %v770_v63 = vpop.xlane.xlu1 %769  ;;  %1155 = vperm.xlu1 %2028, %v876_v33  }
 0x1b2   : > { %v864_v25 = vsel %vm816_vm6, %v770_v63, 0.0  ;;  %vm3237_vm6 = vcmp.ge.s32.totalorder %v2409_v19, 8 }
 0x1b3   : > { %1095 = vperm.xlu0 %2027, %v864_v25   ;;  %v796_v36 = vpop.xlane.xlu0 %795 }
 0x1b4   : > { %v877_v30 = vsel %vm829_vm3, %v796_v36, 0.0  ;;  %vm3234_vm3 = vcmp.ge.s32.totalorder %v2388_v14, 8 }
 0x1b5   : > { %v772_v1 = vpop.xlane.xlu1 %771  ;;  %1160 = vperm.xlu1 %2028, %v877_v30  }
 0x1b6   : > { %v865_v31 = vsel %vm817_vm8, %v772_v1, 0.0  ;;  %vm3239_vm8 = vcmp.ge.s32.totalorder %v2425_v23, 8 }
 0x1b7   : > { %1100 = vperm.xlu0 %2027, %v865_v31   ;;  %v798_v41 = vpop.xlane.xlu0 %797 }
 0x1b8   : > { %v878_v32 = vsel %vm830_vm5, %v798_v41, 0.0  ;;  %vm3236_vm5 = vcmp.ge.s32.totalorder %v2401_v17, 8 }
 0x1b9   : > { %v774_v45 = vpop.xlane.xlu1 %773  ;;  %1165 = vperm.xlu1 %2028, %v878_v32  }
 0x1ba   : > { %v866_v5 = vsel %vm818_vm10, %v774_v45, 0.0  ;;  %vm3240_vm10 = vcmask 523264  }
 0x1bb   : > { %1105 = vperm.xlu0 %2027, %v866_v5   ;;  %v800_v34 = vpop.xlane.xlu0 %799 }
 0x1bc   : > { %v879_v6 = vsel %vm831_vm7, %v800_v34, 0.0  ;;  %vm3238_vm7 = vcmp.ge.s32.totalorder %v2417_v21, 8  ;;  %v2840_v21 = vld [vmem:[%s3217_s2] sm:$0xff] }
 0x1bd   : > { %v776_v57 = vpop.xlane.xlu1 %775  ;;  %1170 = vperm.xlu1 %2028, %v879_v6   ;;  %v2845_v22 = vrot.slane %v2840_v21, %v352_v27  ;;  %v2850_v23 = vrot.slane %v2840_v21, %v428_v28 }
 0x1be   : > { %v867_v46 = vsel %vm819_vm12, %v776_v57, 0.0  ;;  %vm3242_vm12 = vmmov %vm3240_vm10 }
 0x1bf   : > { %1110 = vperm.xlu0 %2027, %v867_v46   ;;  %v802_v37 = vpop.xlane.xlu0 %801 }
 0x1c0   : > { %v880_v7 = vsel %vm832_vm9, %v802_v37, 0.0  ;;  %vm1596_vm9 = vcmask 785408  }
 0x1c1   : > { %v778_v48 = vpop.xlane.xlu1 %777  ;;  %1175 = vperm.xlu1 %2028, %v880_v7  }
 0x1c2   : > { %v868_v8 = vsel %vm3232_vm1, %v778_v48, 0.0 }
 0x1c3   : > { %1115 = vperm.xlu0 %2027, %v868_v8   ;;  %v804_v56 = vpop.xlane.xlu0 %803 }
 0x1c4   : > { %v881_v9 = vsel %vm3233_vm2, %v804_v56, 0.0 }
 0x1c5   : > { %v780_v43 = vpop.xlane.xlu1 %779  ;;  %1180 = vperm.xlu1 %2028, %v881_v9  }
 0x1c6   : > { %v869_v10 = vsel %vm3234_vm3, %v780_v43, 0.0 }
 0x1c7   : > { %1120 = vperm.xlu0 %2027, %v869_v10   ;;  %v806_v0 = vpop.xlane.xlu0 %805 }
 0x1c8   : > { %v882_v11 = vsel %vm3235_vm4, %v806_v0, 0.0 }
 0x1c9   : > { %v782_v38 = vpop.xlane.xlu1 %781  ;;  %1185 = vperm.xlu1 %2028, %v882_v11  }
 0x1ca   : > { %v870_v12 = vsel %vm822_vm13, %v782_v38, 0.0 }
 0x1cb   : > { %1125 = vperm.xlu0 %2027, %v870_v12   ;;  %v808_v35 = vpop.xlane.xlu0 %807 }
 0x1cc   : > { %v883_v13 = vsel %vm3236_vm5, %v808_v35, 0.0 }
 0x1cd   : > { %v784_v40 = vpop.xlane.xlu1 %783  ;;  %1190 = vperm.xlu1 %2028, %v883_v13  }
 0x1ce   : > { %v871_v14 = vsel %vm823_vm15, %v784_v40, 0.0 }
 0x1cf   : > { %1130 = vperm.xlu0 %2027, %v871_v14   ;;  %v810_v50 = vpop.xlane.xlu0 %809 }
 0x1d0   : > { %v884_v15 = vsel %vm3237_vm6, %v810_v50, 0.0 }
 0x1d1   : > { %v786_v51 = vpop.xlane.xlu1 %785  ;;  %1195 = vperm.xlu1 %2028, %v884_v15  }
 0x1d2   : > { %v872_v16 = vsel %vm824_vm11, %v786_v51, 0.0  ;;  %vm3241_vm11 = vmmov %vm3240_vm10 }
 0x1d3   : > { %1135 = vperm.xlu0 %2027, %v872_v16   ;;  %v812_v58 = vpop.xlane.xlu0 %811 }
 0x1d4   : > { %v885_v17 = vsel %vm3238_vm7, %v812_v58, 0.0 }
 0x1d5   : > { %v788_v61 = vpop.xlane.xlu1 %787  ;;  %1200 = vperm.xlu1 %2028, %v885_v17  }
 0x1d6   : > { %v873_v18 = vsel %vm825_vm14, %v788_v61, 0.0 }
 0x1d7   : > { %1140 = vperm.xlu0 %2027, %v873_v18   ;;  %v814_v29 = vpop.xlane.xlu0 %813 }
 0x1d8   : > { %v886_v19 = vsel %vm3239_vm8, %v814_v29, 0.0 }
 0x1d9   : > { %v790_v39 = vpop.xlane.xlu1 %789  ;;  %1205 = vperm.xlu1 %2028, %v886_v19  }
 0x1da   : > { %v874_v20 = vsel %vm826_vm0, %v790_v39, 0.0  ;;  %vm1312_vm0 = vcmask 261120  }
 0x1db   : > { %1145 = vperm.xlu0 %2027, %v874_v20  }
 0x1f8   : > { %v891_v59 = vpop.permute.xlu1 %890 }
 0x1f9   : > { %v1012_v24 = vmul.f32 %v2845_v22, %v891_v59 }
 0x1fb   : > { %v2854_v47 = vadd.f32 %v2850_v23, %v1012_v24 }
 0x1fc   : > { %v956_v42 = vpop.permute.xlu1 %955 }
 0x1fd   : > { %v1025_v54 = vmul.f32 %v2845_v22, %v956_v42 }
 0x1ff   : > { %v2858_v49 = vadd.f32 %v2850_v23, %v1025_v54 }
 0x200   : > { %v961_v55 = vpop.permute.xlu1 %960 }
 0x201   : > { %v1026_v27 = vmul.f32 %v2845_v22, %v961_v55 }
 0x202   : > { %v951_v53 = vpop.permute.xlu0 %950 }
 0x203   : > { %v2862_v2 = vadd.f32 %v2850_v23, %v1026_v27  ;;  %v1024_v28 = vmul.f32 %v2845_v22, %v951_v53 }
 0x204   : > { %v966_v60 = vpop.permute.xlu1 %965 }
 0x205   : > { %v2866_v62 = vadd.f32 %v2850_v23, %v1024_v28  ;;  %v1027_v33 = vmul.f32 %v2845_v22, %v966_v60 }
 0x206   : > { %v896_v4 = vpop.permute.xlu0 %895 }
 0x207   : > { %v2870_v63 = vadd.f32 %v2850_v23, %v1027_v33  ;;  %v1013_v25 = vmul.f32 %v2845_v22, %v896_v4 }
 0x208   : > { %v971_v36 = vpop.permute.xlu1 %970 }
 0x209   : > { %v2874_v52 = vadd.f32 %v2850_v23, %v1013_v25  ;;  %v1028_v3 = vmul.f32 %v2845_v22, %v971_v36  ;;  %v1064_v36 = vmax.f32 %v2854_v47, 0.0 }
 0x20a   : > { %v901_v30 = vpop.permute.xlu0 %900 }
 0x20b   : > { %v2878_v44 = vadd.f32 %v2850_v23, %v1028_v3  ;;  %v1014_v1 = vmul.f32 %v2845_v22, %v901_v30 }
 0x20c   : > { %v976_v31 = vpop.permute.xlu1 %975 }
 0x20d   : > { %v2882_v41 = vadd.f32 %v2850_v23, %v1014_v1  ;;  %v1029_v32 = vmul.f32 %v2845_v22, %v976_v31 }
 0x20e   : > { %v906_v45 = vpop.permute.xlu0 %905 }
 0x20f   : > { %v2886_v5 = vadd.f32 %v2850_v23, %v1029_v32  ;;  %v1015_v34 = vmul.f32 %v2845_v22, %v906_v45 }
 0x210   : > { %v981_v6 = vpop.permute.xlu1 %980 }
 0x211   : > { %v2890_v57 = vadd.f32 %v2850_v23, %v1015_v34  ;;  %v1030_v46 = vmul.f32 %v2845_v22, %v981_v6 }
 0x212   : > { %v911_v37 = vpop.permute.xlu0 %910 }
 0x213   : > { %v2894_v7 = vadd.f32 %v2850_v23, %v1030_v46  ;;  %v1016_v48 = vmul.f32 %v2845_v22, %v911_v37  ;;  %v1076_v46 = vmax.f32 %v2866_v62, 0.0 }
 0x214   : > { %v986_v8 = vpop.permute.xlu1 %985 }
 0x215   : > { %v2898_v56 = vadd.f32 %v2850_v23, %v1016_v48  ;;  %v1031_v9 = vmul.f32 %v2845_v22, %v986_v8 }
 0x216   : > { %v916_v43 = vpop.permute.xlu0 %915 }
 0x217   : > { %v2902_v10 = vadd.f32 %v2850_v23, %v1031_v9  ;;  %v1017_v0 = vmul.f32 %v2845_v22, %v916_v43 }
 0x218   : > { %v991_v11 = vpop.permute.xlu1 %990 }
 0x219   : > { %v2906_v38 = vadd.f32 %v2850_v23, %v1017_v0  ;;  %v1032_v12 = vmul.f32 %v2845_v22, %v991_v11 }
 0x21a   : > { %v921_v35 = vpop.permute.xlu0 %920 }
 0x21b   : > { %v2910_v13 = vadd.f32 %v2850_v23, %v1032_v12  ;;  %v1018_v40 = vmul.f32 %v2845_v22, %v921_v35  ;;  %v1077_v12 = vmax.f32 %v2858_v49, 0.0 }
 0x21c   : > { %v996_v14 = vpop.permute.xlu1 %995 }
 0x21d   : > { %v2914_v50 = vadd.f32 %v2850_v23, %v1018_v40  ;;  %v1033_v15 = vmul.f32 %v2845_v22, %v996_v14  ;;  %v1065_v14 = vmax.f32 %v2874_v52, 0.0  ;;  %v1066_v52 = vmax.f32 %v2882_v41, 0.0 }
 0x21e   : > { %v926_v51 = vpop.permute.xlu0 %925  ;;  %v1067_v41 = vmax.f32 %v2890_v57, 0.0  ;;  %v1068_v57 = vmax.f32 %v2898_v56, 0.0  ;;  %v1069_v56 = vmax.f32 %v2906_v38, 0.0 }
 0x21f   : > { %v2918_v16 = vadd.f32 %v2850_v23, %v1033_v15  ;;  %v1019_v58 = vmul.f32 %v2845_v22, %v926_v51  ;;  %v1070_v38 = vmax.f32 %v2914_v50, 0.0 }
 0x220   : > { %v1001_v17 = vpop.permute.xlu1 %1000 }
 0x221   : > { %v2922_v61 = vadd.f32 %v2850_v23, %v1019_v58  ;;  %v1034_v18 = vmul.f32 %v2845_v22, %v1001_v17 }
 0x222   : > { %v931_v29 = vpop.permute.xlu0 %930 }
 0x223   : > { %v2926_v19 = vadd.f32 %v2850_v23, %v1034_v18  ;;  %v1020_v39 = vmul.f32 %v2845_v22, %v931_v29  ;;  %v1078_v29 = vmax.f32 %v2862_v2, 0.0  ;;  %v1079_v2 = vmax.f32 %v2870_v63, 0.0 }
 0x224   : > { %v1006_v20 = vpop.permute.xlu1 %1005  ;;  %v1080_v63 = vmax.f32 %v2878_v44, 0.0  ;;  %v1081_v44 = vmax.f32 %v2886_v5, 0.0  ;;  %v1082_v5 = vmax.f32 %v2894_v7, 0.0  ;;  %v1083_v7 = vmax.f32 %v2902_v10, 0.0 }
 0x225   : > { %v2930_v59 = vadd.f32 %v2850_v23, %v1020_v39  ;;  %v1035_v24 = vmul.f32 %v2845_v22, %v1006_v20  ;;  %v1071_v50 = vmax.f32 %v2922_v61, 0.0  ;;  %v1084_v10 = vmax.f32 %v2910_v13, 0.0 }
 0x226   : > { %v936_v42 = vpop.permute.xlu0 %935  ;;  %v1085_v13 = vmax.f32 %v2918_v16, 0.0  ;;  %v1086_v16 = vmax.f32 %v2926_v19, 0.0 }
 0x227   : > { %v2934_v54 = vadd.f32 %v2850_v23, %v1035_v24  ;;  %v1021_v55 = vmul.f32 %v2845_v22, %v936_v42  ;;  %v1072_v61 = vmax.f32 %v2930_v59, 0.0 }
 0x228   : > { %v1091_v27 = vpop.permute.xlu1 %1090 }
 0x229   : > { %v2938_v53 = vadd.f32 %v2850_v23, %v1021_v55  ;;  %v1208_v28 = vmul.f32 %v1091_v27, %v2845_v22  ;;  %v1087_v19 = vmax.f32 %v2934_v54, 0.0 }
 0x22a   : > { %v941_v60 = vpop.permute.xlu0 %940 }
 0x22b   : > { %v1232_v33 = vadd.f32 %v1208_v28, %v2850_v23  ;;  %v1022_v4 = vmul.f32 %v2845_v22, %v941_v60  ;;  %v1073_v59 = vmax.f32 %v2938_v53, 0.0 }
 0x22c   : > { %v1151_v25 = vpop.permute.xlu1 %1150 }
 0x22d   : > { %v1256_v3 = vmax.f32 %v1232_v33, 0.0  ;;  %v2945_v30 = vadd.f32 %v2850_v23, %v1022_v4  ;;  %v1220_v1 = vmul.f32 %v1151_v25, %v2845_v22 }
 0x22e   : > { %v946_v31 = vpop.permute.xlu0 %945 }
 0x22f   : > { %v1244_v32 = vadd.f32 %v1220_v1, %v2850_v23  ;;  %v1023_v45 = vmul.f32 %v2845_v22, %v946_v31  ;;  %v1280_v34 = vadd.f32 %v1256_v3, %v1064_v36  ;;  %v1074_v53 = vmax.f32 %v2945_v30, 0.0 }
 0x230   : > { %v1156_v6 = vpop.permute.xlu1 %1155 }
 0x231   : > { %v1268_v37 = vmax.f32 %v1244_v32, 0.0  ;;  %v2952_v48 = vadd.f32 %v2850_v23, %v1023_v45  ;;  %v1221_v47 = vmul.f32 %v1156_v6, %v2845_v22  ;;  %1930 = vmatprep.mubr.msk.f32.mxu0 %vm1312_vm0, %v1280_v34 }
 0x232   : > { %v1096_v8 = vpop.permute.xlu0 %1095 }
 0x233   : > { %v1245_v9 = vadd.f32 %v1221_v47, %v2850_v23  ;;  %v1209_v43 = vmul.f32 %v1096_v8, %v2845_v22  ;;  %v1292_v0 = vadd.f32 %v1268_v37, %v1076_v46 }
 0x234   : > { %v1161_v11 = vpop.permute.xlu1 %1160 }
 0x235   : > { %v1269_v35 = vmax.f32 %v1245_v9, 0.0  ;;  %v1233_v62 = vadd.f32 %v1209_v43, %v2850_v23  ;;  %v1222_v40 = vmul.f32 %v1161_v11, %v2845_v22  ;;  %1948 = vmatprep.mubr.msk.f32.mxu1 %vm1312_vm0, %v1292_v0 }
 0x236   : > { %v1101_v15 = vpop.permute.xlu0 %1100 }
 0x237   : > { %v1293_v51 = vadd.f32 %v1269_v35, %v1077_v12  ;;  %v1257_v58 = vmax.f32 %v1233_v62, 0.0  ;;  %v1246_v17 = vadd.f32 %v1222_v40, %v2850_v23  ;;  %v1210_v18 = vmul.f32 %v1101_v15, %v2845_v22 }
 0x238   : > { %v1166_v39 = vpop.permute.xlu1 %1165 }
 0x239   : > { %v1281_v49 = vadd.f32 %v1257_v58, %v1065_v14  ;;  %v1270_v20 = vmax.f32 %v1246_v17, 0.0  ;;  %v1234_v24 = vadd.f32 %v1210_v18, %v2850_v23  ;;  %v1223_v42 = vmul.f32 %v1166_v39, %v2845_v22  ;;  %1949 = vmatmul.mubr.msk.f32.vlgmr.msra.gmra.mrb[0].mxu1 %vm1312_vm0, %v1293_v51 }
 0x23a   : > { %v1106_v55 = vpop.permute.xlu0 %1105 }
 0x23b   : > { %v1294_v27 = vadd.f32 %v1270_v20, %v1078_v29  ;;  %v1258_v28 = vmax.f32 %v1234_v24, 0.0  ;;  %v1247_v60 = vadd.f32 %v1223_v42, %v2850_v23  ;;  %v1211_v33 = vmul.f32 %v1106_v55, %v2845_v22  ;;  %1931 = vmatmul.mubr.msk.f32.vlgmr.msra.gmra.mrb[0].mxu0 %vm1312_vm0, %v1281_v49 }
 0x23c   : > { %v1171_v4 = vpop.permute.xlu1 %1170 }
 0x23d   : > { %v1282_v25 = vadd.f32 %v1258_v28, %v1066_v52  ;;  %v1271_v36 = vmax.f32 %v1247_v60, 0.0  ;;  %v1235_v3 = vadd.f32 %v1211_v33, %v2850_v23  ;;  %v1224_v1 = vmul.f32 %v1171_v4, %v2845_v22  ;;  %1951 = vmatprep.mubr.msk.f32.mxu1 %vm1312_vm0, %v1294_v27 }
 0x23e   : > { %v1111_v31 = vpop.permute.xlu0 %1110 }
 0x23f   : > { %v1295_v32 = vadd.f32 %v1271_v36, %v1079_v2  ;;  %v1259_v45 = vmax.f32 %v1235_v3, 0.0  ;;  %v1248_v34 = vadd.f32 %v1224_v1, %v2850_v23  ;;  %v1212_v6 = vmul.f32 %v1111_v31, %v2845_v22  ;;  %1933 = vmatprep.mubr.msk.f32.mxu0 %vm1312_vm0, %v1282_v25 }
 0x240   : > { %v1176_v46 = vpop.permute.xlu1 %1175 }
 0x241   : > { %v1283_v37 = vadd.f32 %v1259_v45, %v1067_v41  ;;  %v1272_v47 = vmax.f32 %v1248_v34, 0.0  ;;  %v1236_v8 = vadd.f32 %v1212_v6, %v2850_v23  ;;  %v1225_v9 = vmul.f32 %v1176_v46, %v2845_v22  ;;  %1952 = vmatmul.mubr.msk.f32.gmra.mrb[2].mxu1 %vm1312_vm0, %v1295_v32 }
 0x242   : > { %v1116_v43 = vpop.permute.xlu0 %1115 }
 0x243   : > { %v1296_v0 = vadd.f32 %v1272_v47, %v1080_v63  ;;  %v1260_v11 = vmax.f32 %v1236_v8, 0.0  ;;  %v1249_v12 = vadd.f32 %v1225_v9, %v2850_v23  ;;  %v1213_v35 = vmul.f32 %v1116_v43, %v2845_v22  ;;  %1934 = vmatmul.mubr.msk.f32.gmra.mrb[2].mxu0 %vm1312_vm0, %v1283_v37 }
 0x244   : > { %v1181_v62 = vpop.permute.xlu1 %1180 }
 0x245   : > { %v1284_v40 = vadd.f32 %v1260_v11, %v1068_v57  ;;  %v1273_v14 = vmax.f32 %v1249_v12, 0.0  ;;  %v1237_v15 = vadd.f32 %v1213_v35, %v2850_v23  ;;  %v1226_v51 = vmul.f32 %v1181_v62, %v2845_v22  ;;  %1954 = vmatprep.mubr.msk.f32.mxu1 %vm1312_vm0, %v1296_v0 }
 0x246   : > { %v1121_v58 = vpop.permute.xlu0 %1120 }
 0x247   : > { %v1297_v17 = vadd.f32 %v1273_v14, %v1081_v44  ;;  %v1261_v18 = vmax.f32 %v1237_v15, 0.0  ;;  %v1250_v29 = vadd.f32 %v1226_v51, %v2850_v23  ;;  %v1214_v39 = vmul.f32 %v1121_v58, %v2845_v22  ;;  %1936 = vmatprep.mubr.msk.f32.mxu0 %vm1312_vm0, %v1284_v40 }
 0x248   : > { %v1186_v49 = vpop.permute.xlu1 %1185 }
 0x249   : > { %v1285_v20 = vadd.f32 %v1261_v18, %v1069_v56  ;;  %v1274_v24 = vmax.f32 %v1250_v29, 0.0  ;;  %v1238_v42 = vadd.f32 %v1214_v39, %v2850_v23  ;;  %v1227_v52 = vmul.f32 %v1186_v49, %v2845_v22  ;;  %1955 = vmatmul.mubr.msk.f32.gmra.mrb[4].mxu1 %vm1312_vm0, %v1297_v17 }
 0x24a   : > { %v1126_v55 = vpop.permute.xlu0 %1125 }
 0x24b   : > { %v1298_v27 = vadd.f32 %v1274_v24, %v1082_v5  ;;  %v1262_v28 = vmax.f32 %v1238_v42, 0.0  ;;  %v1251_v60 = vadd.f32 %v1227_v52, %v2850_v23  ;;  %v1215_v33 = vmul.f32 %v1126_v55, %v2845_v22  ;;  %1937 = vmatmul.mubr.msk.f32.gmra.mrb[4].mxu0 %vm1312_vm0, %v1285_v20 }
 0x24c   : > { %v1191_v2 = vpop.permute.xlu1 %1190  ;;  %v1075_v55 = vmax.f32 %v2952_v48, 0.0 }
 0x24d   : > { %v1286_v4 = vadd.f32 %v1262_v28, %v1070_v38  ;;  %v1275_v25 = vmax.f32 %v1251_v60, 0.0  ;;  %v1239_v36 = vadd.f32 %v1215_v33, %v2850_v23  ;;  %v1228_v3 = vmul.f32 %v1191_v2, %v2845_v22  ;;  %1957 = vmatprep.mubr.msk.f32.mxu1 %vm1312_vm0, %v1298_v27 }
 0x24e   : > { %v1131_v1 = vpop.permute.xlu0 %1130 }
 0x24f   : > { %v1299_v41 = vadd.f32 %v1275_v25, %v1083_v7  ;;  %v1263_v31 = vmax.f32 %v1239_v36, 0.0  ;;  %v1252_v32 = vadd.f32 %v1228_v3, %v2850_v23  ;;  %v1216_v45 = vmul.f32 %v1131_v1, %v2845_v22  ;;  %1939 = vmatprep.mubr.msk.f32.mxu0 %vm1312_vm0, %v1286_v4 }
 0x250   : > { %v1196_v34 = vpop.permute.xlu1 %1195 }
 0x251   : > { %v1287_v6 = vadd.f32 %v1263_v31, %v1071_v50  ;;  %v1276_v63 = vmax.f32 %v1252_v32, 0.0  ;;  %v1240_v46 = vadd.f32 %v1216_v45, %v2850_v23  ;;  %v1229_v37 = vmul.f32 %v1196_v34, %v2845_v22  ;;  %1958 = vmatmul.mubr.msk.f32.gmra.mrb[6].mxu1 %vm1312_vm0, %v1299_v41 }
 0x252   : > { %v1136_v47 = vpop.permute.xlu0 %1135 }
 0x253   : > { %v1300_v8 = vadd.f32 %v1276_v63, %v1084_v10  ;;  %v1264_v9 = vmax.f32 %v1240_v46, 0.0  ;;  %v1253_v57 = vadd.f32 %v1229_v37, %v2850_v23  ;;  %v1217_v43 = vmul.f32 %v1136_v47, %v2845_v22  ;;  %1940 = vmatmul.mubr.msk.f32.gmra.mrb[6].mxu0 %vm1312_vm0, %v1287_v6 }
 0x254   : > { %v1201_v0 = vpop.permute.xlu1 %1200 }
 0x255   : > { %v1288_v11 = vadd.f32 %v1264_v9, %v1072_v61  ;;  %v1277_v12 = vmax.f32 %v1253_v57, 0.0  ;;  %v1241_v35 = vadd.f32 %v1217_v43, %v2850_v23  ;;  %v1230_v44 = vmul.f32 %v1201_v0, %v2845_v22  ;;  %1960 = vmatprep.mubr.msk.f32.mxu1 %vm1312_vm0, %v1300_v8 }
 0x256   : > { %v1141_v62 = vpop.permute.xlu0 %1140 }
 0x257   : > { %v1301_v40 = vadd.f32 %v1277_v12, %v1085_v13  ;;  %v1265_v14 = vmax.f32 %v1241_v35, 0.0  ;;  %v1254_v15 = vadd.f32 %v1230_v44, %v2850_v23  ;;  %v1218_v51 = vmul.f32 %v1141_v62, %v2845_v22  ;;  %1942 = vmatprep.mubr.msk.f32.mxu0 %vm1312_vm0, %v1288_v11 }
 0x258   : > { %v1206_v56 = vpop.permute.xlu1 %1205 }
 0x259   : > { %v1289_v58 = vadd.f32 %v1265_v14, %v1073_v59  ;;  %v1278_v17 = vmax.f32 %v1254_v15, 0.0  ;;  %v1242_v18 = vadd.f32 %v1218_v51, %v2850_v23  ;;  %v1231_v29 = vmul.f32 %v1206_v56, %v2845_v22  ;;  %1961 = vmatmul.mubr.msk.f32.gmra.mrb[8].mxu1 %vm1312_vm0, %v1301_v40 }
 0x25a   : > { %v1146_v39 = vpop.permute.xlu0 %1145 }
 0x25b   : > { %v1302_v5 = vadd.f32 %v1278_v17, %v1086_v16  ;;  %v1266_v49 = vmax.f32 %v1242_v18, 0.0  ;;  %v1255_v20 = vadd.f32 %v1231_v29, %v2850_v23  ;;  %v1219_v24 = vmul.f32 %v1146_v39, %v2845_v22  ;;  %1943 = vmatmul.mubr.msk.f32.gmra.mrb[8].mxu0 %vm1312_vm0, %v1289_v58 }
 0x25c   : > { %v1310_v22 = vsub.s32 2, %v2434_v26 }
 0x25d   : > { %v1290_v42 = vadd.f32 %v1266_v49, %v1074_v53  ;;  %v1279_v52 = vmax.f32 %v1255_v20, 0.0  ;;  %v1243_v38 = vadd.f32 %v1219_v24, %v2850_v23  ;;  %1963 = vmatprep.mubr.msk.f32.mxu1 %vm1312_vm0, %v1302_v5 }
 0x25e   : > { %v3046_v54 = vrot.slane %v2840_v21, %v1310_v22 }
 0x25f   : > { %v1303_v30 = vadd.f32 %v1279_v52, %v1087_v19  ;;  %v1267_v27 = vmax.f32 %v1243_v38, 0.0  ;;  %1945 = vmatprep.mubr.msk.f32.mxu0 %vm1312_vm0, %v1290_v42 }
 0x261   : > { %v1291_v28 = vadd.f32 %v1267_v27, %v1075_v55  ;;  %1964 = vmatmul.mubr.msk.f32.gmra.mrb[10].mxu1 %vm1312_vm0, %v1303_v30 }
 0x263   : > { %1946 = vmatmul.mubr.msk.f32.gmra.mrb[10].mxu0 %vm1312_vm0, %v1291_v28 }
 0x30c   : > { %v1950_v60 = vpop.f32.mrb[0].mxu1 }
 0x30d   : > { %v1517_v23 = vadd.f32 %v1950_v60, %v3046_v54  ;;  %v1511_v33 = vpop.f32.mrb[1].mxu1 }
 0x30e   : > { %v1932_v7 = vpop.f32.mrb[0].mxu0  ;;  %v3050_v48 = vadd.f32 %v1511_v33, %v3046_v54 }
 0x30f   : > { %v1457_v2 = vadd.f32 %v1932_v7, %v3046_v54  ;;  %v1451_v4 = vpop.f32.mrb[1].mxu0  ;;  %1614 = vrot.lane.b32.xlu1 %v1517_v23, %s2248_s10 }
 0x310   : > { %v3055_v25 = vadd.f32 %v1451_v4, %v3046_v54 }
 0x311   : > { %1571 = vrot.lane.b32.xlu0 %v1457_v2, %s2248_s10 }
 0x314   : > { %v1953_v26 = vpop.f32.mrb[2].mxu1 }
 0x315   : > { %v1527_v21 = vadd.f32 %v1953_v26, %v3046_v54  ;;  %v1521_v36 = vpop.f32.mrb[3].mxu1 }
 0x316   : > { %v1935_v3 = vpop.f32.mrb[2].mxu0  ;;  %v1522_v41 = vadd.f32 %v1521_v36, %v3046_v54 }
 0x317   : > { %v1467_v50 = vadd.f32 %v1935_v3, %v3046_v54  ;;  %v1461_v1 = vpop.f32.mrb[3].mxu0  ;;  %1622 = vrot.lane.b32.xlu1 %v1527_v21, %s2249_s11 }
 0x318   : > { %v1462_v31 = vadd.f32 %v1461_v1, %v3046_v54 }
 0x319   : > { %1579 = vrot.lane.b32.xlu0 %v1467_v50, %s2249_s11 }
 0x31b   : > { %1618 = vrot.lane.b32.xlu1 %v1522_v41, %s2247_s15 }
 0x31c   : > { %v1956_v32 = vpop.f32.mrb[4].mxu1 }
 0x31d   : > { %1575 = vrot.lane.b32.xlu0 %v1462_v31, %s2247_s15  ;;  %v1537_v45 = vadd.f32 %v1956_v32, %v3046_v54  ;;  %v1531_v10 = vpop.f32.mrb[5].mxu1 }
 0x31e   : > { %v1938_v34 = vpop.f32.mrb[4].mxu0  ;;  %v3068_v6 = vadd.f32 %v1531_v10, %v3046_v54 }
 0x31f   : > { %v1477_v63 = vadd.f32 %v1938_v34, %v3046_v54  ;;  %v1471_v46 = vpop.f32.mrb[5].mxu0 }
 0x320   : > { %v3072_v37 = vadd.f32 %v1471_v46, %v3046_v54 }
 0x321   : > { %1583 = vrot.lane.b32.xlu1 %v1477_v63, %s2248_s10  ;;  %1626 = vrot.lane.b32.xlu0 %v1537_v45, %s2248_s10 }
 0x324   : > { %v1959_v61 = vpop.f32.mrb[6].mxu1 }
 0x325   : > { %v1541_v47 = vpop.f32.mrb[7].mxu1  ;;  %v1547_v29 = vadd.f32 %v1959_v61, %v3046_v54 }
 0x326   : > { %v1941_v8 = vpop.f32.mrb[6].mxu0  ;;  %v1542_v9 = vadd.f32 %v1541_v47, %v3046_v54 }
 0x327   : > { %v1487_v57 = vadd.f32 %v1941_v8, %v3046_v54  ;;  %v1481_v43 = vpop.f32.mrb[7].mxu0 }
 0x328   : > { %1630 = vrot.lane.b32.xlu0 %v1542_v9, %s2247_s15  ;;  %v1482_v13 = vadd.f32 %v1481_v43, %v3046_v54 }
 0x329   : > { %1591 = vrot.lane.b32.xlu1 %v1487_v57, %s2249_s11 }
 0x32c   : > { %v1962_v0 = vpop.f32.mrb[8].mxu1 }
 0x32d   : > { %1587 = vrot.lane.b32.xlu1 %v1482_v13, %s2247_s15  ;;  %v1557_v11 = vadd.f32 %v1962_v0, %v3046_v54  ;;  %v1551_v12 = vpop.f32.mrb[9].mxu1 }
 0x32e   : > { %v1944_v35 = vpop.f32.mrb[8].mxu0  ;;  %v3084_v44 = vadd.f32 %v1551_v12, %v3046_v54 }
 0x32f   : > { %v1497_v59 = vadd.f32 %v1944_v35, %v3046_v54  ;;  %v1491_v62 = vpop.f32.mrb[9].mxu0 }
 0x330   : > { %v3088_v40 = vadd.f32 %v1491_v62, %v3046_v54 }
 0x331   : > { %1602 = vrot.lane.b32.xlu0 %v1497_v59, %s2248_s10  ;;  %1638 = vrot.lane.b32.xlu1 %v1557_v11, %s2248_s10  ;;  %s2155_s10 = scalar_lea.vmem %s2154_s9, 512 }
 0x332   : > { %p2157_p2 = scmp.lt.s32.totalorder %s2155_s10, %s2149_s7 }
 0x334   : > { %v1965_v14 = vpop.f32.mrb[10].mxu1  ;;  %p2158_p3 = por %p2157_p2, %p2156_p1 }
 0x335   : > { %v1561_v15 = vpop.f32.mrb[11].mxu1  ;;  %v1567_v17 = vadd.f32 %v1965_v14, %v3046_v54 }
 0x336   : > { %v1947_v51 = vpop.f32.mrb[10].mxu0  ;;  %v1562_v16 = vadd.f32 %v1561_v15, %v3046_v54  ;;  %p2159_p4 = pnand %p2158_p3, %p2152_p0 }
 0x337   : > { %v1507_v56 = vadd.f32 %v1947_v51, %v3046_v54  ;;  %v1501_v58 = vpop.f32.mrb[11].mxu0 }
 0x338   : > { %1642 = vrot.lane.b32.xlu1 %v1562_v16, %s2247_s15  ;;  %v1502_v18 = vadd.f32 %v1501_v58, %v3046_v54 }
 0x339   : > { %1610 = vrot.lane.b32.xlu0 %v1507_v56, %s2249_s11 }
 0x33c   : > { %1646 = vrot.lane.b32.xlu1 %v1567_v17, %s2249_s11 }
 0x33d   : > { %1606 = vrot.lane.b32.xlu0 %v1502_v18, %s2247_s15  ;;  %s3113_s15 = scalar_lea.vmem [#allocation4], %s1809_s13 }
 0x341   : > { %1634 = vrot.lane.b32.xlu0 %v1547_v29, %s2249_s11 }
 0x381   : > { %v1615_v53 = vpop.permute.xlu1 %1614 }
 0x382   : > { %v1652_v20 = vsel %vm1312_vm0, %v3050_v48, %v1615_v53 }
 0x383   : > { %v1572_v39 = vpop.permute.xlu0 %1571 }
 0x384   : > { %v1594_v42 = vsel %vm1312_vm0, %v3055_v25, %v1572_v39 }
 0x389   : > { %v1623_v5 = vpop.permute.xlu1 %1622 }
 0x38b   : > { %v1580_v49 = vpop.permute.xlu0 %1579 }
 0x38d   : > { %v1619_v24 = vpop.permute.xlu1 %1618 }
 0x38e   : > { %v1653_v19 = vsel %vm3240_vm10, %v1652_v20, %v1619_v24 }
 0x38f   : > { %v1654_v52 = vsel %vm1596_vm9, %v1653_v19, %v1623_v5  ;;  %v1576_v38 = vpop.permute.xlu0 %1575 }
 0x390   : > { %1664 = vst [vmem:[%s3113_s15 + $0x8] sm:$0xff] %v1654_v52  ;;  %v1595_v55 = vsel %vm3241_vm11, %v1594_v42, %v1576_v38 }
 0x391   : > { %v1597_v30 = vsel %vm1596_vm9, %v1595_v55, %v1580_v49 }
 0x392   : > { %1661 = vst [vmem:[%s235_s16] sm:$0xff] %v1597_v30 }
 0x393   : > { %v1584_v27 = vpop.permute.xlu1 %1583  ;;  %v1627_v22 = vpop.permute.xlu0 %1626 }
 0x394   : > { %v1598_v54 = vsel %vm1312_vm0, %v3072_v37, %v1584_v27 }
 0x39a   : > { %v1631_v7 = vpop.permute.xlu0 %1630 }
 0x39b   : > { %v1592_v28 = vpop.permute.xlu1 %1591 }
 0x39f   : > { %v1588_v60 = vpop.permute.xlu1 %1587 }
 0x3a0   : > { %v1599_v23 = vsel %vm3242_vm12, %v1598_v54, %v1588_v60 }
 0x3a1   : > { %v1600_v33 = vsel %vm1596_vm9, %v1599_v23, %v1592_v28 }
 0x3a2   : > { %1662 = vst [vmem:[%s235_s16 + $0x8] sm:$0xff] %v1600_v33 }
 0x3a3   : > { %2162 = shalt.err (!%p2159_p4)
}
 0x3a4   : > { %s2163_s11 = scalar_lea.hbm %s3125_s30, 256  ;;  %s2167_s16 = scalar_lea.hbm %s3219_s4, 1024 }
 0x3a5   : > { %p2164_p7 = scmp.ne.s32.totalorder %s3125_s30, %s2163_s11  ;;  %p2168_p10 = scmp.lt.u32.totalorder %s3125_s30, %s3219_s4 }
 0x3a6   : > { %p2169_p11 = scmp.lt.u32.totalorder %s2167_s16, %s2163_s11  ;;  %p2171_p13 = scmp.lt.u32.totalorder %s2163_s11, %s3125_s30 }
 0x3a7   : > { %p2165_p8 = pnand %p2164_p7, %p2320_p5 }
 0x3a8   : > { %p2170_p12 = por %p2169_p11, %p2168_p10 }
 0x3a9   : > { %p2166_p9 = pneg %p2165_p8 }
 0x3aa   : > { %p2172_p0 = por %p2171_p13, %p2170_p12 }
 0x3ac   : > { %p2173_p1 = pnand %p2172_p0, %p2166_p9 }
 0x3ae   : > { %2176 = shalt.err (!%p2173_p1)
}
 0x3af   : > { %1978 = dma.vmem_to_hbm [thread:$0]  (%p2320_p5), %s3127_s23, 256, %s3125_s30, %s1668_s6   ;;  %v1639_v48 = vpop.permute.xlu1 %1638  ;;  %v1603_v2 = vpop.permute.xlu0 %1602  ;;  %vm3243_vm13 = vmmov %vm3240_vm10  ;;  %v1655_v32 = vsel %vm1312_vm0, %v3068_v6, %v1627_v22 }
 0x3b0   : > { %v1658_v26 = vsel %vm1312_vm0, %v3084_v44, %v1639_v48  ;;  %v1649_v3 = vsel %vm1312_vm0, %v3088_v40, %v1603_v2  ;;  %vm3244_vm14 = vmmov %vm3240_vm10  ;;  %s1893_s23 = sshll.u32 %s2303_s22, 9  ;;  %s1701_s26 = sshll.u32 %s3113_s15, 4  ;;  %s3172_s26 = int_to_ptr.vmem [resolvable:$true] %s1701_s26 }
 0x3b1   : > { %vm3245_vm15 = vmmov %vm3240_vm10  ;;  %s3170_s7 = scalar_lea.hbm %s3220_s5, %s1893_s23  ;;  %s1673_s22 = scalar_lea.sflag [#allocation5], %s3103_s12 }
 0x3b2   : > { %v1656_v45 = vsel %vm3245_vm15, %v1655_v32, %v1631_v7  ;;  %s2177_s8 = scalar_lea.vmem %s3172_s26, 512  ;;  %s2251_s9 = smov [#allocation4]  }
 0x3b3   : > { %v1643_v4 = vpop.permute.xlu1 %1642  ;;  %v1611_v25 = vpop.permute.xlu0 %1610  ;;  %p2178_p2 = scmp.ne.s32.totalorder %s3172_s26, %s2177_s8  ;;  %s2181_s10 = sshll.u32 %s2251_s9, 4  ;;  %s2182_s10 = int_to_ptr.vmem [resolvable:$false] %s2181_s10 }
 0x3b4   : > { %v1659_v21 = vsel %vm3243_vm13, %v1658_v26, %v1643_v4  ;;  %s2183_s11 = scalar_lea.vmem %s2182_s10, 1024  ;;  %p2184_p7 = scmp.lt.s32.totalorder %s3172_s26, %s2182_s10 }
 0x3b5   : > { %p2179_p3 = pnand %p2178_p2, %p2320_p5  ;;  %p2185_p8 = scmp.lt.s32.totalorder %s2183_s11, %s2177_s8 }
 0x3b7   : > { %v1647_v36 = vpop.permute.xlu1 %1646  ;;  %v1607_v50 = vpop.permute.xlu0 %1606  ;;  %p2180_p4 = pneg %p2179_p3  ;;  %p2186_p9 = por %p2185_p8, %p2184_p7 }
 0x3b8   : > { %v1660_v1 = vsel %vm1596_vm9, %v1659_v21, %v1647_v36  ;;  %v1650_v41 = vsel %vm3244_vm14, %v1649_v3, %v1607_v50 }
 0x3b9   : > { %1666 = vst [vmem:[%s3113_s15 + $0x18] sm:$0xff] %v1660_v1  ;;  %v1651_v31 = vsel %vm1596_vm9, %v1650_v41, %v1611_v25  ;;  %p2187_p10 = pnand %p2186_p9, %p2180_p4 }
 0x3ba   : > { %1663 = vst [vmem:[%s3113_s15] sm:$0xff] %v1651_v31 }
 0x3bb   : > { %v1635_v10 = vpop.permute.xlu0 %1634 }
 0x3bc   : > { %v1657_v34 = vsel %vm1596_vm9, %v1656_v45, %v1635_v10 }
 0x3bd   : > { %1665 = vst [vmem:[%s3113_s15 + $0x10] sm:$0xff] %v1657_v34 }
 0x3be   : > { %2190 = shalt.err (!%p2187_p10)
}
 0x3bf   : > { %s2191_s12 = scalar_lea.hbm %s3170_s7, 512  ;;  %s2195_s14 = scalar_lea.hbm %s3220_s5, 2048 }
 0x3c0   : > { %p2192_p11 = scmp.ne.s32.totalorder %s3170_s7, %s2191_s12  ;;  %p2196_p0 = scmp.lt.u32.totalorder %s3170_s7, %s3220_s5 }
 0x3c1   : > { %p2197_p1 = scmp.lt.u32.totalorder %s2195_s14, %s2191_s12  ;;  %p2199_p3 = scmp.lt.u32.totalorder %s2191_s12, %s3170_s7 }
 0x3c2   : > { %p2193_p12 = pnand %p2192_p11, %p2320_p5 }
 0x3c3   : > { %p2198_p2 = por %p2197_p1, %p2196_p0 }
 0x3c4   : > { %p2194_p13 = pneg %p2193_p12 }
 0x3c5   : > { %p2200_p4 = por %p2199_p3, %p2198_p2 }
 0x3c7   : > { %p2201_p7 = pnand %p2200_p4, %p2194_p13 }
 0x3c9   : > { %2204 = shalt.err (!%p2201_p7)
}
 0x3ca   : > { %1979 = dma.vmem_to_hbm [thread:$0]  (%p2320_p5), %s3172_s26, 512, %s3170_s7, %s1673_s22  }
 0x3cb PF: > { %p1989_p8 = scmp.ge.s32.totalorder %s2243_s21, 2  ;;  %s1713_s25 = sand.u32 1, %s2231_s18  }
 0x3cc   : > { %s1714_s23 = scalar_lea.sflag [#allocation3], %s1713_s25 }
 0x3cd   : > { %p1983_p9 = pnand %p1989_p8, %p2324_p6 }
 0x3cf   : > { %2222 = dma.done.wait (!%p1983_p9), %s1714_s23, 256  }
 0x3d0   : > { %2224 = vsyncadd (!%p1983_p9), %s1714_s23, 4294967040  ;;  %s1723_s30 = scalar_lea.sflag [#allocation5], %s1713_s25 }
 0x3d1   : > { %2226 = dma.done.wait (!%p1983_p9), %s1723_s30, 512  }
 0x3d2   : > { %2228 = vsyncadd (!%p1983_p9), %s1723_s30, 4294966784  ;;  %p19_p5 = scmp.ge.s32.totalorder %s2307_s24, 6   ;;  %s3246_s18 = smov %s2235_s19 }
 0x3d3   : > { %s3247_s19 = smov %s2239_s20  ;;  %s3248_s20 = smov %s2318_s27 }
 0x3d4   : > { %s3249_s21 = smov %s2307_s24  ;;  %21 = sbr.rel (!%p19_p5) target bundleno = 5 (0x5), region = 91 }
 0x3db   :  { %1728 = vsyncpa [#allocation3], 1 }
 0x3dc   :  { %1730 = vsyncpa [#allocation3 + $0x1], 1 }
 0x3dd   :  { %1731 = vsyncpa [#allocation5], 1 }
 0x3de   :  { %1733 = vsyncpa [#allocation5 + $0x1], 1 }

</bundles_post_ra>
